<compile_context>
chip_gen: v6e
topology: v6e:2x2x1
jax: 0.10.0
libtpu: 0.0.40
codegen_flags: <defaults>
</compile_context>

<pallas_src>
import functools

import jax
import jax.numpy as jnp
from jax.experimental import pallas as pl
from jax.experimental.pallas import tpu as pltpu


# ------------------------------ fused kernel --------------------------------

def _ark_decoder_fused_kernel(x_ref, *refs, num_layer, num_heads, hidden, ffn):
    """x_ref: (C, tn, H) channel-major token tile.  refs = per-layer weights
    (wqkv, wo, w1, w2, packed-vec) * num_layer, then (w_avg, w_max, b_reduce,
    msum, mexp), then the (tn, H) output ref."""
    o_ref = refs[-1]
    wrefs = refs[:-1]

    H, F, NH = hidden, ffn, num_heads
    C, tn, _ = x_ref.shape
    M = C * tn

    (w_avg_ref, w_max_ref, b_red_ref, msum_ref, mexp_ref) = wrefs[num_layer * 5:]
    msum = msum_ref[...]          # (H, NH) f32 head one-hot (per-head lane sum)
    mexp = mexp_ref[...]          # (NH, H) f32 head one-hot (per-head broadcast)

    def mm(a, w_ref):
        # (M, Din) fp32 -> bf16 cast right before the MXU, fp32 accumulation.
        return jnp.dot(a.astype(jnp.bfloat16), w_ref[...],
                       preferred_element_type=jnp.float32)

    def layer_norm(z, g, b):
        mu = jnp.mean(z, axis=-1, keepdims=True)
        d = z - mu
        var = jnp.mean(d * d, axis=-1, keepdims=True)
        return d * jax.lax.rsqrt(var + 1e-5) * g + b

    # (C, tn, H) -> (C*tn, H): layout no-op (tn % 8 == 0), rows channel-major.
    x = x_ref[...].reshape(M, H).astype(jnp.float32)

    for l in range(num_layer):
        wqkv_ref, wo_ref, w1_ref, w2_ref, vec_ref = wrefs[l * 5:(l + 1) * 5]

        # Fused QKV projection; attention scale is already folded into Wq/bq.
        qkv = mm(x, wqkv_ref) + vec_ref[:, 0:3 * H]          # (M, 3H)
        q = qkv[:, 0:H]
        k = qkv[:, H:2 * H]
        v = qkv[:, 2 * H:3 * H]

        # --- multi-head attention across the channel axis (C is tiny) ------
        # Scores against key-channel j for every (query-channel, token) row:
        # s_j[(i,t), h] = sum_d q[i,t,h,d] * k[j,t,h,d]  via a head-mask matmul.
        s_list = []
        for j in range(C):
            kj = jnp.concatenate([k[j * tn:(j + 1) * tn, :]] * C, axis=0)
            s_list.append(jnp.dot(q * kj, msum,
                                  preferred_element_type=jnp.float32))  # (M, NH)
        m = s_list[0]
        for j in range(1, C):
            m = jnp.maximum(m, s_list[j])

        denom = jnp.zeros((M, NH), jnp.float32)
        ctx = jnp.zeros((M, H), jnp.float32)
        for j in range(C):
            e = jnp.exp(s_list[j] - m)                        # (M, NH)
            denom = denom + e
            vj = jnp.concatenate([v[j * tn:(j + 1) * tn, :]] * C, axis=0)
            ctx = ctx + jnp.dot(e, mexp,
                                preferred_element_type=jnp.float32) * vj
        inv = pl.reciprocal(denom, approx=True)               # EUP, denom >= 1
        ctx = ctx * jnp.dot(inv, mexp, preferred_element_type=jnp.float32)

        attn = mm(ctx, wo_ref) + vec_ref[:, 3 * H:4 * H]
        h1 = layer_norm(x + attn,
                        vec_ref[:, 4 * H:5 * H], vec_ref[:, 5 * H:6 * H])

        ff = jnp.maximum(mm(h1, w1_ref) + vec_ref[:, 6 * H:6 * H + F], 0.0)
        ff = mm(ff, w2_ref) + vec_ref[:, 6 * H + F:7 * H + F]
        x = layer_norm(h1 + ff,
                       vec_ref[:, 7 * H + F:8 * H + F],
                       vec_ref[:, 8 * H + F:9 * H + F])

    # --- channel pooling (mean & max over the C channel blocks) ------------
    avg = x[0:tn, :]
    mx = x[0:tn, :]
    for c in range(1, C):
        blk = x[c * tn:(c + 1) * tn, :]
        avg = avg + blk
        mx = jnp.maximum(mx, blk)
    avg = avg * (1.0 / C)

    # dim_reduce, concat-free (weight pre-split into avg/max halves).
    y = (jnp.dot(avg.astype(jnp.bfloat16), w_avg_ref[...],
                 preferred_element_type=jnp.float32)
         + jnp.dot(mx.astype(jnp.bfloat16), w_max_ref[...],
                   preferred_element_type=jnp.float32)
         + b_red_ref[...])
    o_ref[...] = y.astype(o_ref.dtype)


# ------------------------------ host wrapper ---------------------------------

def _full_spec(a):
    """Whole-array, VMEM-resident block (constant index_map)."""
    r = a.ndim
    return pl.BlockSpec(a.shape, lambda i, _r=r: (0,) * _r)


def _pick_tile(n_pad, cap):
    """Largest multiple-of-8 divisor of n_pad that is <= cap, preferring at
    least 2 grid steps (so a 2-TensorCore chip keeps both cores busy)."""
    best_single = 8
    for t in range(min(cap, n_pad), 7, -1):
        if n_pad % t == 0 and t % 8 == 0:
            if n_pad // t >= 2:
                return t
            best_single = max(best_single, t)
    return best_single


def ark_decoder_forward(x_cbsh, params, num_heads):
    """x_cbsh: (num_channels, batch, steps, hidden) -> (batch, steps, hidden)."""
    C, B, S, H = x_cbsh.shape
    assert H % num_heads == 0
    hd = H // num_heads
    scale = 1.0 / float(hd) ** 0.5
    N = B * S

    layers = params['layers']
    num_layer = len(layers)
    F = layers[0]['w1'].shape[1]

    # Channel-major token layout (no transpose needed): (C, N, H).
    x = x_cbsh.reshape(C, N, H)

    # ---- host-side weight packing (bf16 weights, packed f32 vectors) -------
    weights = []
    for lp in layers:
        wqkv = jnp.concatenate(
            [lp['wq'] * scale, lp['wk'], lp['wv']], axis=1).astype(jnp.bfloat16)
        vec = jnp.concatenate([
            lp['bq'].reshape(-1) * scale, lp['bk'].reshape(-1),
            lp['bv'].reshape(-1), lp['bo'].reshape(-1),
            lp['ln1_g'].reshape(-1), lp['ln1_b'].reshape(-1),
            lp['b1'].reshape(-1), lp['b2'].reshape(-1),
            lp['ln2_g'].reshape(-1), lp['ln2_b'].reshape(-1),
        ]).astype(jnp.float32)[None, :]                        # (1, 9H + F)
        weights += [wqkv, lp['wo'].astype(jnp.bfloat16),
                    lp['w1'].astype(jnp.bfloat16), lp['w2'].astype(jnp.bfloat16),
                    vec]

    w_red = params['w_reduce']
    weights += [w_red[:H, :].astype(jnp.bfloat16),
                w_red[H:, :].astype(jnp.bfloat16),
                params['b_reduce'].astype(jnp.float32)]

    head_id = jnp.arange(H, dtype=jnp.int32) // hd
    msum = (head_id[:, None] ==
            jnp.arange(num_heads, dtype=jnp.int32)[None, :]).astype(jnp.float32)
    weights += [msum, msum.T]                                  # (H,NH), (NH,H)

    # ---- token padding, tile choice, VMEM budget ----------------------------
    N_pad = ((N + 7) // 8) * 8
    if N_pad != N:
        x = jnp.pad(x, ((0, 0), (0, N_pad - N), (0, 0)))

    per_token_act = C * (12 * H + 2 * F) * 4                   # rough fp32 bytes
    cap = max(8, min(512, (8 * (1 << 20) // max(per_token_act, 1)) // 8 * 8))
    tn = _pick_tile(N_pad, cap)
    grid = (N_pad // tn,)

    weight_bytes = sum(int(w.size) * w.dtype.itemsize for w in weights)
    act_bytes = per_token_act * tn
    vmem_limit = int(min(100 * (1 << 20),
                         max(32 * (1 << 20), 4 * weight_bytes + 8 * act_bytes)))

    kern = functools.partial(_ark_decoder_fused_kernel,
                             num_layer=num_layer, num_heads=num_heads,
                             hidden=H, ffn=F)

    y = pl.pallas_call(
        kern,
        out_shape=jax.ShapeDtypeStruct((N_pad, H), jnp.float32),
        grid=grid,
        in_specs=[pl.BlockSpec((C, tn, H), lambda i: (0, i, 0))]
                 + [_full_spec(w) for w in weights],
        out_specs=pl.BlockSpec((tn, H), lambda i: (i, 0)),
        compiler_params=pltpu.CompilerParams(
            dimension_semantics=("parallel",),
            vmem_limit_bytes=vmem_limit),
    )(x, *weights)
    return y[:N].reshape(B, S, H)


# ------------------------------ params ---------------------------------------

def init_params(key, hidden, num_layer, ffn_dim):
    def nrm(k, shape, scale=0.05):
        return scale * jax.random.normal(k, shape, jnp.float32)

    layers = []
    keys = jax.random.split(key, num_layer + 1)
    for l in range(num_layer):
        ks = jax.random.split(keys[l], 6)
        layers.append(dict(
            wq=nrm(ks[0], (hidden, hidden)),
            wk=nrm(ks[1], (hidden, hidden)),
            wv=nrm(ks[2], (hidden, hidden)),
            bq=jnp.zeros((hidden,), jnp.float32),
            bk=jnp.zeros((hidden,), jnp.float32),
            bv=jnp.zeros((hidden,), jnp.float32),
            wo=nrm(ks[3], (hidden, hidden)),
            bo=jnp.zeros((hidden,), jnp.float32),
            ln1_g=jnp.ones((hidden,), jnp.float32),
            ln1_b=jnp.zeros((hidden,), jnp.float32),
            w1=nrm(ks[4], (hidden, ffn_dim)),
            b1=jnp.zeros((ffn_dim,), jnp.float32),
            w2=nrm(ks[5], (ffn_dim, hidden)),
            b2=jnp.zeros((hidden,), jnp.float32),
            ln2_g=jnp.ones((hidden,), jnp.float32),
            ln2_b=jnp.zeros((hidden,), jnp.float32),
        ))
    kd = jax.random.split(keys[-1], 1)[0]
    return dict(
        layers=layers,
        w_reduce=nrm(kd, (2 * hidden, hidden)),   # nn.Linear(2H, H), x @ W form
        b_reduce=jnp.zeros((1, hidden), jnp.float32),
    )


# ------------------------------ main ------------------------------------------

if __name__ == "__main__":
    hidden_size = 32
    num_heads = 4
    num_layer = 2
    num_channels = 4
    batch, steps = 2, 8
    ffn_dim = 4 * hidden_size

    key = jax.random.PRNGKey(0)
    kx, kp = jax.random.split(key)

    x = jax.random.normal(
        kx, (num_channels, batch, steps, hidden_size), jnp.float32)
    params = init_params(kp, hidden_size, num_layer, ffn_dim)

    y = ark_decoder_forward(x, params, num_heads)
    y = jax.block_until_ready(y)
    assert y.shape == (batch, steps, hidden_size), y.shape
    assert bool(jnp.all(jnp.isfinite(y)))
    print("KERNEL_OK")
</pallas_src>

<mosaic_0001>
module attributes {stable_mosaic.version = 11 : i64} {
  func.func @_ark_decoder_fused_kernel(%arg0: i32, %arg1: memref<4x8x32xf32, #tpu.memory_space<vmem>>, %arg2: memref<32x96xbf16, #tpu.memory_space<vmem>>, %arg3: memref<32x32xbf16, #tpu.memory_space<vmem>>, %arg4: memref<32x128xbf16, #tpu.memory_space<vmem>>, %arg5: memref<128x32xbf16, #tpu.memory_space<vmem>>, %arg6: memref<1x416xf32, #tpu.memory_space<vmem>>, %arg7: memref<32x96xbf16, #tpu.memory_space<vmem>>, %arg8: memref<32x32xbf16, #tpu.memory_space<vmem>>, %arg9: memref<32x128xbf16, #tpu.memory_space<vmem>>, %arg10: memref<128x32xbf16, #tpu.memory_space<vmem>>, %arg11: memref<1x416xf32, #tpu.memory_space<vmem>>, %arg12: memref<32x32xbf16, #tpu.memory_space<vmem>>, %arg13: memref<32x32xbf16, #tpu.memory_space<vmem>>, %arg14: memref<1x32xf32, #tpu.memory_space<vmem>>, %arg15: memref<32x4xf32, #tpu.memory_space<vmem>>, %arg16: memref<4x32xf32, #tpu.memory_space<vmem>>, %arg17: memref<8x32xf32, #tpu.memory_space<vmem>>) attributes {dimension_semantics = [#tpu.dimension_semantics<parallel>], iteration_bounds = array<i64: 2>, scalar_prefetch = 0 : i64, scratch_operands = 0 : i64, tpu.core_type = #tpu.core_type<tc>, window_params = [{transform_indices = @transform_0, window_bounds = array<i64: 4, 8, 32>}, {pipeline_mode = #tpu.pipeline_mode<synchronous>, transform_indices = @transform_1, window_bounds = array<i64: 32, 96>}, {pipeline_mode = #tpu.pipeline_mode<synchronous>, transform_indices = @transform_2, window_bounds = array<i64: 32, 32>}, {pipeline_mode = #tpu.pipeline_mode<synchronous>, transform_indices = @transform_3, window_bounds = array<i64: 32, 128>}, {pipeline_mode = #tpu.pipeline_mode<synchronous>, transform_indices = @transform_4, window_bounds = array<i64: 128, 32>}, {pipeline_mode = #tpu.pipeline_mode<synchronous>, transform_indices = @transform_5, window_bounds = array<i64: 1, 416>}, {pipeline_mode = #tpu.pipeline_mode<synchronous>, transform_indices = @transform_6, window_bounds = array<i64: 32, 96>}, {pipeline_mode = #tpu.pipeline_mode<synchronous>, transform_indices = @transform_7, window_bounds = array<i64: 32, 32>}, {pipeline_mode = #tpu.pipeline_mode<synchronous>, transform_indices = @transform_8, window_bounds = array<i64: 32, 128>}, {pipeline_mode = #tpu.pipeline_mode<synchronous>, transform_indices = @transform_9, window_bounds = array<i64: 128, 32>}, {pipeline_mode = #tpu.pipeline_mode<synchronous>, transform_indices = @transform_10, window_bounds = array<i64: 1, 416>}, {pipeline_mode = #tpu.pipeline_mode<synchronous>, transform_indices = @transform_11, window_bounds = array<i64: 32, 32>}, {pipeline_mode = #tpu.pipeline_mode<synchronous>, transform_indices = @transform_12, window_bounds = array<i64: 32, 32>}, {pipeline_mode = #tpu.pipeline_mode<synchronous>, transform_indices = @transform_13, window_bounds = array<i64: 1, 32>}, {pipeline_mode = #tpu.pipeline_mode<synchronous>, transform_indices = @transform_14, window_bounds = array<i64: 32, 4>}, {pipeline_mode = #tpu.pipeline_mode<synchronous>, transform_indices = @transform_15, window_bounds = array<i64: 4, 32>}, {transform_indices = @transform_16, window_bounds = array<i64: 8, 32>}]} {
    %c0 = arith.constant 0 : index
    %c0_0 = arith.constant 0 : index
    %0 = vector.load %arg15[%c0, %c0_0] : memref<32x4xf32, #tpu.memory_space<vmem>>, vector<32x4xf32>
    %c0_1 = arith.constant 0 : index
    %c0_2 = arith.constant 0 : index
    %1 = vector.load %arg16[%c0_1, %c0_2] : memref<4x32xf32, #tpu.memory_space<vmem>>, vector<4x32xf32>
    %c0_3 = arith.constant 0 : index
    %c0_4 = arith.constant 0 : index
    %c0_5 = arith.constant 0 : index
    %2 = vector.load %arg1[%c0_3, %c0_4, %c0_5] : memref<4x8x32xf32, #tpu.memory_space<vmem>>, vector<4x8x32xf32>
    %3 = vector.shape_cast %2 : vector<4x8x32xf32> to vector<32x32xf32>
    %4 = arith.truncf %3 : vector<32x32xf32> to vector<32x32xbf16>
    %c0_6 = arith.constant 0 : index
    %c0_7 = arith.constant 0 : index
    %5 = vector.load %arg2[%c0_6, %c0_7] : memref<32x96xbf16, #tpu.memory_space<vmem>>, vector<32x96xbf16>
    %cst = arith.constant dense<0.000000e+00> : vector<32x96xf32>
    %6 = tpu.matmul %4, %5, %cst {dimension_numbers = #tpu.dot_dimension_numbers<[1], [0], [0], [1], [0, 0, 1, 1], [], []>} : vector<32x32xbf16>, vector<32x96xbf16>, vector<32x96xf32> -> vector<32x96xf32>
    %c0_8 = arith.constant 0 : index
    %c0_9 = arith.constant 0 : index
    %7 = vector.load %arg6[%c0_8, %c0_9] : memref<1x416xf32, #tpu.memory_space<vmem>>, vector<1x96xf32>
    %8 = vector.broadcast %7 : vector<1x96xf32> to vector<32x96xf32>
    %9 = arith.addf %6, %8 : vector<32x96xf32>
    %10 = vector.extract_strided_slice %9 {offsets = [0, 0], sizes = [32, 32], strides = [1, 1]} : vector<32x96xf32> to vector<32x32xf32>
    %11 = vector.extract_strided_slice %9 {offsets = [0, 32], sizes = [32, 32], strides = [1, 1]} : vector<32x96xf32> to vector<32x32xf32>
    %12 = vector.extract_strided_slice %9 {offsets = [0, 64], sizes = [32, 32], strides = [1, 1]} : vector<32x96xf32> to vector<32x32xf32>
    %13 = vector.extract_strided_slice %11 {offsets = [0, 0], sizes = [8, 32], strides = [1, 1]} : vector<32x32xf32> to vector<8x32xf32>
    %14 = tpu.concatenate %13, %13, %13, %13 in 0 : vector<8x32xf32>, vector<8x32xf32>, vector<8x32xf32>, vector<8x32xf32> -> vector<32x32xf32>
    %15 = arith.mulf %10, %14 : vector<32x32xf32>
    %cst_10 = arith.constant dense<0.000000e+00> : vector<32x4xf32>
    %16 = tpu.matmul %15, %0, %cst_10 {dimension_numbers = #tpu.dot_dimension_numbers<[1], [0], [0], [1], [0, 0, 1, 1], [], []>} : vector<32x32xf32>, vector<32x4xf32>, vector<32x4xf32> -> vector<32x4xf32>
    %17 = vector.extract_strided_slice %11 {offsets = [8, 0], sizes = [8, 32], strides = [1, 1]} : vector<32x32xf32> to vector<8x32xf32>
    %18 = tpu.concatenate %17, %17, %17, %17 in 0 : vector<8x32xf32>, vector<8x32xf32>, vector<8x32xf32>, vector<8x32xf32> -> vector<32x32xf32>
    %19 = arith.mulf %10, %18 : vector<32x32xf32>
    %cst_11 = arith.constant dense<0.000000e+00> : vector<32x4xf32>
    %20 = tpu.matmul %19, %0, %cst_11 {dimension_numbers = #tpu.dot_dimension_numbers<[1], [0], [0], [1], [0, 0, 1, 1], [], []>} : vector<32x32xf32>, vector<32x4xf32>, vector<32x4xf32> -> vector<32x4xf32>
    %21 = vector.extract_strided_slice %11 {offsets = [16, 0], sizes = [8, 32], strides = [1, 1]} : vector<32x32xf32> to vector<8x32xf32>
    %22 = tpu.concatenate %21, %21, %21, %21 in 0 : vector<8x32xf32>, vector<8x32xf32>, vector<8x32xf32>, vector<8x32xf32> -> vector<32x32xf32>
    %23 = arith.mulf %10, %22 : vector<32x32xf32>
    %cst_12 = arith.constant dense<0.000000e+00> : vector<32x4xf32>
    %24 = tpu.matmul %23, %0, %cst_12 {dimension_numbers = #tpu.dot_dimension_numbers<[1], [0], [0], [1], [0, 0, 1, 1], [], []>} : vector<32x32xf32>, vector<32x4xf32>, vector<32x4xf32> -> vector<32x4xf32>
    %25 = vector.extract_strided_slice %11 {offsets = [24, 0], sizes = [8, 32], strides = [1, 1]} : vector<32x32xf32> to vector<8x32xf32>
    %26 = tpu.concatenate %25, %25, %25, %25 in 0 : vector<8x32xf32>, vector<8x32xf32>, vector<8x32xf32>, vector<8x32xf32> -> vector<32x32xf32>
    %27 = arith.mulf %10, %26 : vector<32x32xf32>
    %cst_13 = arith.constant dense<0.000000e+00> : vector<32x4xf32>
    %28 = tpu.matmul %27, %0, %cst_13 {dimension_numbers = #tpu.dot_dimension_numbers<[1], [0], [0], [1], [0, 0, 1, 1], [], []>} : vector<32x32xf32>, vector<32x4xf32>, vector<32x4xf32> -> vector<32x4xf32>
    %29 = arith.maximumf %16, %20 : vector<32x4xf32>
    %30 = arith.maximumf %29, %24 : vector<32x4xf32>
    %31 = arith.maximumf %30, %28 : vector<32x4xf32>
    %cst_14 = arith.constant 0.000000e+00 : f32
    %32 = vector.broadcast %cst_14 : f32 to vector<32x4xf32>
    %cst_15 = arith.constant 0.000000e+00 : f32
    %33 = vector.broadcast %cst_15 : f32 to vector<32x32xf32>
    %34 = arith.subf %16, %31 : vector<32x4xf32>
    %35 = math.exp %34 : vector<32x4xf32>
    %36 = arith.addf %32, %35 : vector<32x4xf32>
    %37 = vector.extract_strided_slice %12 {offsets = [0, 0], sizes = [8, 32], strides = [1, 1]} : vector<32x32xf32> to vector<8x32xf32>
    %38 = tpu.concatenate %37, %37, %37, %37 in 0 : vector<8x32xf32>, vector<8x32xf32>, vector<8x32xf32>, vector<8x32xf32> -> vector<32x32xf32>
    %cst_16 = arith.constant dense<0.000000e+00> : vector<32x32xf32>
    %39 = tpu.matmul %35, %1, %cst_16 {dimension_numbers = #tpu.dot_dimension_numbers<[1], [0], [0], [1], [0, 0, 1, 1], [], []>} : vector<32x4xf32>, vector<4x32xf32>, vector<32x32xf32> -> vector<32x32xf32>
    %40 = arith.mulf %39, %38 : vector<32x32xf32>
    %41 = arith.addf %33, %40 : vector<32x32xf32>
    %42 = arith.subf %20, %31 : vector<32x4xf32>
    %43 = math.exp %42 : vector<32x4xf32>
    %44 = arith.addf %36, %43 : vector<32x4xf32>
    %45 = vector.extract_strided_slice %12 {offsets = [8, 0], sizes = [8, 32], strides = [1, 1]} : vector<32x32xf32> to vector<8x32xf32>
    %46 = tpu.concatenate %45, %45, %45, %45 in 0 : vector<8x32xf32>, vector<8x32xf32>, vector<8x32xf32>, vector<8x32xf32> -> vector<32x32xf32>
    %cst_17 = arith.constant dense<0.000000e+00> : vector<32x32xf32>
    %47 = tpu.matmul %43, %1, %cst_17 {dimension_numbers = #tpu.dot_dimension_numbers<[1], [0], [0], [1], [0, 0, 1, 1], [], []>} : vector<32x4xf32>, vector<4x32xf32>, vector<32x32xf32> -> vector<32x32xf32>
    %48 = arith.mulf %47, %46 : vector<32x32xf32>
    %49 = arith.addf %41, %48 : vector<32x32xf32>
    %50 = arith.subf %24, %31 : vector<32x4xf32>
    %51 = math.exp %50 : vector<32x4xf32>
    %52 = arith.addf %44, %51 : vector<32x4xf32>
    %53 = vector.extract_strided_slice %12 {offsets = [16, 0], sizes = [8, 32], strides = [1, 1]} : vector<32x32xf32> to vector<8x32xf32>
    %54 = tpu.concatenate %53, %53, %53, %53 in 0 : vector<8x32xf32>, vector<8x32xf32>, vector<8x32xf32>, vector<8x32xf32> -> vector<32x32xf32>
    %cst_18 = arith.constant dense<0.000000e+00> : vector<32x32xf32>
    %55 = tpu.matmul %51, %1, %cst_18 {dimension_numbers = #tpu.dot_dimension_numbers<[1], [0], [0], [1], [0, 0, 1, 1], [], []>} : vector<32x4xf32>, vector<4x32xf32>, vector<32x32xf32> -> vector<32x32xf32>
    %56 = arith.mulf %55, %54 : vector<32x32xf32>
    %57 = arith.addf %49, %56 : vector<32x32xf32>
    %58 = arith.subf %28, %31 : vector<32x4xf32>
    %59 = math.exp %58 : vector<32x4xf32>
    %60 = arith.addf %52, %59 : vector<32x4xf32>
    %61 = vector.extract_strided_slice %12 {offsets = [24, 0], sizes = [8, 32], strides = [1, 1]} : vector<32x32xf32> to vector<8x32xf32>
    %62 = tpu.concatenate %61, %61, %61, %61 in 0 : vector<8x32xf32>, vector<8x32xf32>, vector<8x32xf32>, vector<8x32xf32> -> vector<32x32xf32>
    %cst_19 = arith.constant dense<0.000000e+00> : vector<32x32xf32>
    %63 = tpu.matmul %59, %1, %cst_19 {dimension_numbers = #tpu.dot_dimension_numbers<[1], [0], [0], [1], [0, 0, 1, 1], [], []>} : vector<32x4xf32>, vector<4x32xf32>, vector<32x32xf32> -> vector<32x32xf32>
    %64 = arith.mulf %63, %62 : vector<32x32xf32>
    %65 = arith.addf %57, %64 : vector<32x32xf32>
    %66 = tpu.reciprocal %60 {approx = true} : vector<32x4xf32> -> vector<32x4xf32>
    %cst_20 = arith.constant dense<0.000000e+00> : vector<32x32xf32>
    %67 = tpu.matmul %66, %1, %cst_20 {dimension_numbers = #tpu.dot_dimension_numbers<[1], [0], [0], [1], [0, 0, 1, 1], [], []>} : vector<32x4xf32>, vector<4x32xf32>, vector<32x32xf32> -> vector<32x32xf32>
    %68 = arith.mulf %65, %67 : vector<32x32xf32>
    %69 = arith.truncf %68 : vector<32x32xf32> to vector<32x32xbf16>
    %c0_21 = arith.constant 0 : index
    %c0_22 = arith.constant 0 : index
    %70 = vector.load %arg3[%c0_21, %c0_22] : memref<32x32xbf16, #tpu.memory_space<vmem>>, vector<32x32xbf16>
    %cst_23 = arith.constant dense<0.000000e+00> : vector<32x32xf32>
    %71 = tpu.matmul %69, %70, %cst_23 {dimension_numbers = #tpu.dot_dimension_numbers<[1], [0], [0], [1], [0, 0, 1, 1], [], []>} : vector<32x32xbf16>, vector<32x32xbf16>, vector<32x32xf32> -> vector<32x32xf32>
    %c0_24 = arith.constant 0 : index
    %c96 = arith.constant 96 : index
    %72 = vector.load %arg6[%c0_24, %c96] : memref<1x416xf32, #tpu.memory_space<vmem>>, vector<1x32xf32>
    %73 = vector.broadcast %72 : vector<1x32xf32> to vector<32x32xf32>
    %74 = arith.addf %71, %73 : vector<32x32xf32>
    %75 = arith.addf %3, %74 : vector<32x32xf32>
    %c0_25 = arith.constant 0 : index
    %c128 = arith.constant 128 : index
    %76 = vector.load %arg6[%c0_25, %c128] : memref<1x416xf32, #tpu.memory_space<vmem>>, vector<1x32xf32>
    %c0_26 = arith.constant 0 : index
    %c160 = arith.constant 160 : index
    %77 = vector.load %arg6[%c0_26, %c160] : memref<1x416xf32, #tpu.memory_space<vmem>>, vector<1x32xf32>
    %cst_27 = arith.constant dense<0.000000e+00> : vector<32xf32>
    %78 = vector.multi_reduction <add>, %75, %cst_27 [1] : vector<32x32xf32> to vector<32xf32>
    %79 = vector.shape_cast %78 : vector<32xf32> to vector<32x1xf32>
    %cst_28 = arith.constant 3.200000e+01 : f32
    %80 = vector.broadcast %cst_28 : f32 to vector<32x1xf32>
    %81 = arith.divf %79, %80 : vector<32x1xf32>
    %82 = vector.broadcast %81 : vector<32x1xf32> to vector<32x32xf32>
    %83 = arith.subf %75, %82 : vector<32x32xf32>
    %84 = arith.mulf %83, %83 : vector<32x32xf32>
    %cst_29 = arith.constant dense<0.000000e+00> : vector<32xf32>
    %85 = vector.multi_reduction <add>, %84, %cst_29 [1] : vector<32x32xf32> to vector<32xf32>
    %86 = vector.shape_cast %85 : vector<32xf32> to vector<32x1xf32>
    %cst_30 = arith.constant 3.200000e+01 : f32
    %87 = vector.broadcast %cst_30 : f32 to vector<32x1xf32>
    %88 = arith.divf %86, %87 : vector<32x1xf32>
    %cst_31 = arith.constant 9.99999974E-6 : f32
    %89 = vector.broadcast %cst_31 : f32 to vector<32x1xf32>
    %90 = arith.addf %88, %89 : vector<32x1xf32>
    %91 = math.rsqrt %90 : vector<32x1xf32>
    %92 = vector.broadcast %91 : vector<32x1xf32> to vector<32x32xf32>
    %93 = arith.mulf %83, %92 : vector<32x32xf32>
    %94 = vector.broadcast %76 : vector<1x32xf32> to vector<32x32xf32>
    %95 = arith.mulf %93, %94 : vector<32x32xf32>
    %96 = vector.broadcast %77 : vector<1x32xf32> to vector<32x32xf32>
    %97 = arith.addf %95, %96 : vector<32x32xf32>
    %98 = arith.truncf %97 : vector<32x32xf32> to vector<32x32xbf16>
    %c0_32 = arith.constant 0 : index
    %c0_33 = arith.constant 0 : index
    %99 = vector.load %arg4[%c0_32, %c0_33] : memref<32x128xbf16, #tpu.memory_space<vmem>>, vector<32x128xbf16>
    %cst_34 = arith.constant dense<0.000000e+00> : vector<32x128xf32>
    %100 = tpu.matmul %98, %99, %cst_34 {dimension_numbers = #tpu.dot_dimension_numbers<[1], [0], [0], [1], [0, 0, 1, 1], [], []>} : vector<32x32xbf16>, vector<32x128xbf16>, vector<32x128xf32> -> vector<32x128xf32>
    %c0_35 = arith.constant 0 : index
    %c192 = arith.constant 192 : index
    %101 = vector.load %arg6[%c0_35, %c192] : memref<1x416xf32, #tpu.memory_space<vmem>>, vector<1x128xf32>
    %102 = vector.broadcast %101 : vector<1x128xf32> to vector<32x128xf32>
    %103 = arith.addf %100, %102 : vector<32x128xf32>
    %cst_36 = arith.constant 0.000000e+00 : f32
    %104 = vector.broadcast %cst_36 : f32 to vector<32x128xf32>
    %105 = arith.maximumf %103, %104 : vector<32x128xf32>
    %106 = arith.truncf %105 : vector<32x128xf32> to vector<32x128xbf16>
    %c0_37 = arith.constant 0 : index
    %c0_38 = arith.constant 0 : index
    %107 = vector.load %arg5[%c0_37, %c0_38] : memref<128x32xbf16, #tpu.memory_space<vmem>>, vector<128x32xbf16>
    %cst_39 = arith.constant dense<0.000000e+00> : vector<32x32xf32>
    %108 = tpu.matmul %106, %107, %cst_39 {dimension_numbers = #tpu.dot_dimension_numbers<[1], [0], [0], [1], [0, 0, 1, 1], [], []>} : vector<32x128xbf16>, vector<128x32xbf16>, vector<32x32xf32> -> vector<32x32xf32>
    %c0_40 = arith.constant 0 : index
    %c320 = arith.constant 320 : index
    %109 = vector.load %arg6[%c0_40, %c320] : memref<1x416xf32, #tpu.memory_space<vmem>>, vector<1x32xf32>
    %110 = vector.broadcast %109 : vector<1x32xf32> to vector<32x32xf32>
    %111 = arith.addf %108, %110 : vector<32x32xf32>
    %112 = arith.addf %97, %111 : vector<32x32xf32>
    %c0_41 = arith.constant 0 : index
    %c352 = arith.constant 352 : index
    %113 = vector.load %arg6[%c0_41, %c352] : memref<1x416xf32, #tpu.memory_space<vmem>>, vector<1x32xf32>
    %c0_42 = arith.constant 0 : index
    %c384 = arith.constant 384 : index
    %114 = vector.load %arg6[%c0_42, %c384] : memref<1x416xf32, #tpu.memory_space<vmem>>, vector<1x32xf32>
    %cst_43 = arith.constant dense<0.000000e+00> : vector<32xf32>
    %115 = vector.multi_reduction <add>, %112, %cst_43 [1] : vector<32x32xf32> to vector<32xf32>
    %116 = vector.shape_cast %115 : vector<32xf32> to vector<32x1xf32>
    %cst_44 = arith.constant 3.200000e+01 : f32
    %117 = vector.broadcast %cst_44 : f32 to vector<32x1xf32>
    %118 = arith.divf %116, %117 : vector<32x1xf32>
    %119 = vector.broadcast %118 : vector<32x1xf32> to vector<32x32xf32>
    %120 = arith.subf %112, %119 : vector<32x32xf32>
    %121 = arith.mulf %120, %120 : vector<32x32xf32>
    %cst_45 = arith.constant dense<0.000000e+00> : vector<32xf32>
    %122 = vector.multi_reduction <add>, %121, %cst_45 [1] : vector<32x32xf32> to vector<32xf32>
    %123 = vector.shape_cast %122 : vector<32xf32> to vector<32x1xf32>
    %cst_46 = arith.constant 3.200000e+01 : f32
    %124 = vector.broadcast %cst_46 : f32 to vector<32x1xf32>
    %125 = arith.divf %123, %124 : vector<32x1xf32>
    %cst_47 = arith.constant 9.99999974E-6 : f32
    %126 = vector.broadcast %cst_47 : f32 to vector<32x1xf32>
    %127 = arith.addf %125, %126 : vector<32x1xf32>
    %128 = math.rsqrt %127 : vector<32x1xf32>
    %129 = vector.broadcast %128 : vector<32x1xf32> to vector<32x32xf32>
    %130 = arith.mulf %120, %129 : vector<32x32xf32>
    %131 = vector.broadcast %113 : vector<1x32xf32> to vector<32x32xf32>
    %132 = arith.mulf %130, %131 : vector<32x32xf32>
    %133 = vector.broadcast %114 : vector<1x32xf32> to vector<32x32xf32>
    %134 = arith.addf %132, %133 : vector<32x32xf32>
    %135 = arith.truncf %134 : vector<32x32xf32> to vector<32x32xbf16>
    %c0_48 = arith.constant 0 : index
    %c0_49 = arith.constant 0 : index
    %136 = vector.load %arg7[%c0_48, %c0_49] : memref<32x96xbf16, #tpu.memory_space<vmem>>, vector<32x96xbf16>
    %cst_50 = arith.constant dense<0.000000e+00> : vector<32x96xf32>
    %137 = tpu.matmul %135, %136, %cst_50 {dimension_numbers = #tpu.dot_dimension_numbers<[1], [0], [0], [1], [0, 0, 1, 1], [], []>} : vector<32x32xbf16>, vector<32x96xbf16>, vector<32x96xf32> -> vector<32x96xf32>
    %c0_51 = arith.constant 0 : index
    %c0_52 = arith.constant 0 : index
    %138 = vector.load %arg11[%c0_51, %c0_52] : memref<1x416xf32, #tpu.memory_space<vmem>>, vector<1x96xf32>
    %139 = vector.broadcast %138 : vector<1x96xf32> to vector<32x96xf32>
    %140 = arith.addf %137, %139 : vector<32x96xf32>
    %141 = vector.extract_strided_slice %140 {offsets = [0, 0], sizes = [32, 32], strides = [1, 1]} : vector<32x96xf32> to vector<32x32xf32>
    %142 = vector.extract_strided_slice %140 {offsets = [0, 32], sizes = [32, 32], strides = [1, 1]} : vector<32x96xf32> to vector<32x32xf32>
    %143 = vector.extract_strided_slice %140 {offsets = [0, 64], sizes = [32, 32], strides = [1, 1]} : vector<32x96xf32> to vector<32x32xf32>
    %144 = vector.extract_strided_slice %142 {offsets = [0, 0], sizes = [8, 32], strides = [1, 1]} : vector<32x32xf32> to vector<8x32xf32>
    %145 = tpu.concatenate %144, %144, %144, %144 in 0 : vector<8x32xf32>, vector<8x32xf32>, vector<8x32xf32>, vector<8x32xf32> -> vector<32x32xf32>
    %146 = arith.mulf %141, %145 : vector<32x32xf32>
    %cst_53 = arith.constant dense<0.000000e+00> : vector<32x4xf32>
    %147 = tpu.matmul %146, %0, %cst_53 {dimension_numbers = #tpu.dot_dimension_numbers<[1], [0], [0], [1], [0, 0, 1, 1], [], []>} : vector<32x32xf32>, vector<32x4xf32>, vector<32x4xf32> -> vector<32x4xf32>
    %148 = vector.extract_strided_slice %142 {offsets = [8, 0], sizes = [8, 32], strides = [1, 1]} : vector<32x32xf32> to vector<8x32xf32>
    %149 = tpu.concatenate %148, %148, %148, %148 in 0 : vector<8x32xf32>, vector<8x32xf32>, vector<8x32xf32>, vector<8x32xf32> -> vector<32x32xf32>
    %150 = arith.mulf %141, %149 : vector<32x32xf32>
    %cst_54 = arith.constant dense<0.000000e+00> : vector<32x4xf32>
    %151 = tpu.matmul %150, %0, %cst_54 {dimension_numbers = #tpu.dot_dimension_numbers<[1], [0], [0], [1], [0, 0, 1, 1], [], []>} : vector<32x32xf32>, vector<32x4xf32>, vector<32x4xf32> -> vector<32x4xf32>
    %152 = vector.extract_strided_slice %142 {offsets = [16, 0], sizes = [8, 32], strides = [1, 1]} : vector<32x32xf32> to vector<8x32xf32>
    %153 = tpu.concatenate %152, %152, %152, %152 in 0 : vector<8x32xf32>, vector<8x32xf32>, vector<8x32xf32>, vector<8x32xf32> -> vector<32x32xf32>
    %154 = arith.mulf %141, %153 : vector<32x32xf32>
    %cst_55 = arith.constant dense<0.000000e+00> : vector<32x4xf32>
    %155 = tpu.matmul %154, %0, %cst_55 {dimension_numbers = #tpu.dot_dimension_numbers<[1], [0], [0], [1], [0, 0, 1, 1], [], []>} : vector<32x32xf32>, vector<32x4xf32>, vector<32x4xf32> -> vector<32x4xf32>
    %156 = vector.extract_strided_slice %142 {offsets = [24, 0], sizes = [8, 32], strides = [1, 1]} : vector<32x32xf32> to vector<8x32xf32>
    %157 = tpu.concatenate %156, %156, %156, %156 in 0 : vector<8x32xf32>, vector<8x32xf32>, vector<8x32xf32>, vector<8x32xf32> -> vector<32x32xf32>
    %158 = arith.mulf %141, %157 : vector<32x32xf32>
    %cst_56 = arith.constant dense<0.000000e+00> : vector<32x4xf32>
    %159 = tpu.matmul %158, %0, %cst_56 {dimension_numbers = #tpu.dot_dimension_numbers<[1], [0], [0], [1], [0, 0, 1, 1], [], []>} : vector<32x32xf32>, vector<32x4xf32>, vector<32x4xf32> -> vector<32x4xf32>
    %160 = arith.maximumf %147, %151 : vector<32x4xf32>
    %161 = arith.maximumf %160, %155 : vector<32x4xf32>
    %162 = arith.maximumf %161, %159 : vector<32x4xf32>
    %cst_57 = arith.constant 0.000000e+00 : f32
    %163 = vector.broadcast %cst_57 : f32 to vector<32x4xf32>
    %cst_58 = arith.constant 0.000000e+00 : f32
    %164 = vector.broadcast %cst_58 : f32 to vector<32x32xf32>
    %165 = arith.subf %147, %162 : vector<32x4xf32>
    %166 = math.exp %165 : vector<32x4xf32>
    %167 = arith.addf %163, %166 : vector<32x4xf32>
    %168 = vector.extract_strided_slice %143 {offsets = [0, 0], sizes = [8, 32], strides = [1, 1]} : vector<32x32xf32> to vector<8x32xf32>
    %169 = tpu.concatenate %168, %168, %168, %168 in 0 : vector<8x32xf32>, vector<8x32xf32>, vector<8x32xf32>, vector<8x32xf32> -> vector<32x32xf32>
    %cst_59 = arith.constant dense<0.000000e+00> : vector<32x32xf32>
    %170 = tpu.matmul %166, %1, %cst_59 {dimension_numbers = #tpu.dot_dimension_numbers<[1], [0], [0], [1], [0, 0, 1, 1], [], []>} : vector<32x4xf32>, vector<4x32xf32>, vector<32x32xf32> -> vector<32x32xf32>
    %171 = arith.mulf %170, %169 : vector<32x32xf32>
    %172 = arith.addf %164, %171 : vector<32x32xf32>
    %173 = arith.subf %151, %162 : vector<32x4xf32>
    %174 = math.exp %173 : vector<32x4xf32>
    %175 = arith.addf %167, %174 : vector<32x4xf32>
    %176 = vector.extract_strided_slice %143 {offsets = [8, 0], sizes = [8, 32], strides = [1, 1]} : vector<32x32xf32> to vector<8x32xf32>
    %177 = tpu.concatenate %176, %176, %176, %176 in 0 : vector<8x32xf32>, vector<8x32xf32>, vector<8x32xf32>, vector<8x32xf32> -> vector<32x32xf32>
    %cst_60 = arith.constant dense<0.000000e+00> : vector<32x32xf32>
    %178 = tpu.matmul %174, %1, %cst_60 {dimension_numbers = #tpu.dot_dimension_numbers<[1], [0], [0], [1], [0, 0, 1, 1], [], []>} : vector<32x4xf32>, vector<4x32xf32>, vector<32x32xf32> -> vector<32x32xf32>
    %179 = arith.mulf %178, %177 : vector<32x32xf32>
    %180 = arith.addf %172, %179 : vector<32x32xf32>
    %181 = arith.subf %155, %162 : vector<32x4xf32>
    %182 = math.exp %181 : vector<32x4xf32>
    %183 = arith.addf %175, %182 : vector<32x4xf32>
    %184 = vector.extract_strided_slice %143 {offsets = [16, 0], sizes = [8, 32], strides = [1, 1]} : vector<32x32xf32> to vector<8x32xf32>
    %185 = tpu.concatenate %184, %184, %184, %184 in 0 : vector<8x32xf32>, vector<8x32xf32>, vector<8x32xf32>, vector<8x32xf32> -> vector<32x32xf32>
    %cst_61 = arith.constant dense<0.000000e+00> : vector<32x32xf32>
    %186 = tpu.matmul %182, %1, %cst_61 {dimension_numbers = #tpu.dot_dimension_numbers<[1], [0], [0], [1], [0, 0, 1, 1], [], []>} : vector<32x4xf32>, vector<4x32xf32>, vector<32x32xf32> -> vector<32x32xf32>
    %187 = arith.mulf %186, %185 : vector<32x32xf32>
    %188 = arith.addf %180, %187 : vector<32x32xf32>
    %189 = arith.subf %159, %162 : vector<32x4xf32>
    %190 = math.exp %189 : vector<32x4xf32>
    %191 = arith.addf %183, %190 : vector<32x4xf32>
    %192 = vector.extract_strided_slice %143 {offsets = [24, 0], sizes = [8, 32], strides = [1, 1]} : vector<32x32xf32> to vector<8x32xf32>
    %193 = tpu.concatenate %192, %192, %192, %192 in 0 : vector<8x32xf32>, vector<8x32xf32>, vector<8x32xf32>, vector<8x32xf32> -> vector<32x32xf32>
    %cst_62 = arith.constant dense<0.000000e+00> : vector<32x32xf32>
    %194 = tpu.matmul %190, %1, %cst_62 {dimension_numbers = #tpu.dot_dimension_numbers<[1], [0], [0], [1], [0, 0, 1, 1], [], []>} : vector<32x4xf32>, vector<4x32xf32>, vector<32x32xf32> -> vector<32x32xf32>
    %195 = arith.mulf %194, %193 : vector<32x32xf32>
    %196 = arith.addf %188, %195 : vector<32x32xf32>
    %197 = tpu.reciprocal %191 {approx = true} : vector<32x4xf32> -> vector<32x4xf32>
    %cst_63 = arith.constant dense<0.000000e+00> : vector<32x32xf32>
    %198 = tpu.matmul %197, %1, %cst_63 {dimension_numbers = #tpu.dot_dimension_numbers<[1], [0], [0], [1], [0, 0, 1, 1], [], []>} : vector<32x4xf32>, vector<4x32xf32>, vector<32x32xf32> -> vector<32x32xf32>
    %199 = arith.mulf %196, %198 : vector<32x32xf32>
    %200 = arith.truncf %199 : vector<32x32xf32> to vector<32x32xbf16>
    %c0_64 = arith.constant 0 : index
    %c0_65 = arith.constant 0 : index
    %201 = vector.load %arg8[%c0_64, %c0_65] : memref<32x32xbf16, #tpu.memory_space<vmem>>, vector<32x32xbf16>
    %cst_66 = arith.constant dense<0.000000e+00> : vector<32x32xf32>
    %202 = tpu.matmul %200, %201, %cst_66 {dimension_numbers = #tpu.dot_dimension_numbers<[1], [0], [0], [1], [0, 0, 1, 1], [], []>} : vector<32x32xbf16>, vector<32x32xbf16>, vector<32x32xf32> -> vector<32x32xf32>
    %c0_67 = arith.constant 0 : index
    %c96_68 = arith.constant 96 : index
    %203 = vector.load %arg11[%c0_67, %c96_68] : memref<1x416xf32, #tpu.memory_space<vmem>>, vector<1x32xf32>
    %204 = vector.broadcast %203 : vector<1x32xf32> to vector<32x32xf32>
    %205 = arith.addf %202, %204 : vector<32x32xf32>
    %206 = arith.addf %134, %205 : vector<32x32xf32>
    %c0_69 = arith.constant 0 : index
    %c128_70 = arith.constant 128 : index
    %207 = vector.load %arg11[%c0_69, %c128_70] : memref<1x416xf32, #tpu.memory_space<vmem>>, vector<1x32xf32>
    %c0_71 = arith.constant 0 : index
    %c160_72 = arith.constant 160 : index
    %208 = vector.load %arg11[%c0_71, %c160_72] : memref<1x416xf32, #tpu.memory_space<vmem>>, vector<1x32xf32>
    %cst_73 = arith.constant dense<0.000000e+00> : vector<32xf32>
    %209 = vector.multi_reduction <add>, %206, %cst_73 [1] : vector<32x32xf32> to vector<32xf32>
    %210 = vector.shape_cast %209 : vector<32xf32> to vector<32x1xf32>
    %cst_74 = arith.constant 3.200000e+01 : f32
    %211 = vector.broadcast %cst_74 : f32 to vector<32x1xf32>
    %212 = arith.divf %210, %211 : vector<32x1xf32>
    %213 = vector.broadcast %212 : vector<32x1xf32> to vector<32x32xf32>
    %214 = arith.subf %206, %213 : vector<32x32xf32>
    %215 = arith.mulf %214, %214 : vector<32x32xf32>
    %cst_75 = arith.constant dense<0.000000e+00> : vector<32xf32>
    %216 = vector.multi_reduction <add>, %215, %cst_75 [1] : vector<32x32xf32> to vector<32xf32>
    %217 = vector.shape_cast %216 : vector<32xf32> to vector<32x1xf32>
    %cst_76 = arith.constant 3.200000e+01 : f32
    %218 = vector.broadcast %cst_76 : f32 to vector<32x1xf32>
    %219 = arith.divf %217, %218 : vector<32x1xf32>
    %cst_77 = arith.constant 9.99999974E-6 : f32
    %220 = vector.broadcast %cst_77 : f32 to vector<32x1xf32>
    %221 = arith.addf %219, %220 : vector<32x1xf32>
    %222 = math.rsqrt %221 : vector<32x1xf32>
    %223 = vector.broadcast %222 : vector<32x1xf32> to vector<32x32xf32>
    %224 = arith.mulf %214, %223 : vector<32x32xf32>
    %225 = vector.broadcast %207 : vector<1x32xf32> to vector<32x32xf32>
    %226 = arith.mulf %224, %225 : vector<32x32xf32>
    %227 = vector.broadcast %208 : vector<1x32xf32> to vector<32x32xf32>
    %228 = arith.addf %226, %227 : vector<32x32xf32>
    %229 = arith.truncf %228 : vector<32x32xf32> to vector<32x32xbf16>
    %c0_78 = arith.constant 0 : index
    %c0_79 = arith.constant 0 : index
    %230 = vector.load %arg9[%c0_78, %c0_79] : memref<32x128xbf16, #tpu.memory_space<vmem>>, vector<32x128xbf16>
    %cst_80 = arith.constant dense<0.000000e+00> : vector<32x128xf32>
    %231 = tpu.matmul %229, %230, %cst_80 {dimension_numbers = #tpu.dot_dimension_numbers<[1], [0], [0], [1], [0, 0, 1, 1], [], []>} : vector<32x32xbf16>, vector<32x128xbf16>, vector<32x128xf32> -> vector<32x128xf32>
    %c0_81 = arith.constant 0 : index
    %c192_82 = arith.constant 192 : index
    %232 = vector.load %arg11[%c0_81, %c192_82] : memref<1x416xf32, #tpu.memory_space<vmem>>, vector<1x128xf32>
    %233 = vector.broadcast %232 : vector<1x128xf32> to vector<32x128xf32>
    %234 = arith.addf %231, %233 : vector<32x128xf32>
    %cst_83 = arith.constant 0.000000e+00 : f32
    %235 = vector.broadcast %cst_83 : f32 to vector<32x128xf32>
    %236 = arith.maximumf %234, %235 : vector<32x128xf32>
    %237 = arith.truncf %236 : vector<32x128xf32> to vector<32x128xbf16>
    %c0_84 = arith.constant 0 : index
    %c0_85 = arith.constant 0 : index
    %238 = vector.load %arg10[%c0_84, %c0_85] : memref<128x32xbf16, #tpu.memory_space<vmem>>, vector<128x32xbf16>
    %cst_86 = arith.constant dense<0.000000e+00> : vector<32x32xf32>
    %239 = tpu.matmul %237, %238, %cst_86 {dimension_numbers = #tpu.dot_dimension_numbers<[1], [0], [0], [1], [0, 0, 1, 1], [], []>} : vector<32x128xbf16>, vector<128x32xbf16>, vector<32x32xf32> -> vector<32x32xf32>
    %c0_87 = arith.constant 0 : index
    %c320_88 = arith.constant 320 : index
    %240 = vector.load %arg11[%c0_87, %c320_88] : memref<1x416xf32, #tpu.memory_space<vmem>>, vector<1x32xf32>
    %241 = vector.broadcast %240 : vector<1x32xf32> to vector<32x32xf32>
    %242 = arith.addf %239, %241 : vector<32x32xf32>
    %243 = arith.addf %228, %242 : vector<32x32xf32>
    %c0_89 = arith.constant 0 : index
    %c352_90 = arith.constant 352 : index
    %244 = vector.load %arg11[%c0_89, %c352_90] : memref<1x416xf32, #tpu.memory_space<vmem>>, vector<1x32xf32>
    %c0_91 = arith.constant 0 : index
    %c384_92 = arith.constant 384 : index
    %245 = vector.load %arg11[%c0_91, %c384_92] : memref<1x416xf32, #tpu.memory_space<vmem>>, vector<1x32xf32>
    %cst_93 = arith.constant dense<0.000000e+00> : vector<32xf32>
    %246 = vector.multi_reduction <add>, %243, %cst_93 [1] : vector<32x32xf32> to vector<32xf32>
    %247 = vector.shape_cast %246 : vector<32xf32> to vector<32x1xf32>
    %cst_94 = arith.constant 3.200000e+01 : f32
    %248 = vector.broadcast %cst_94 : f32 to vector<32x1xf32>
    %249 = arith.divf %247, %248 : vector<32x1xf32>
    %250 = vector.broadcast %249 : vector<32x1xf32> to vector<32x32xf32>
    %251 = arith.subf %243, %250 : vector<32x32xf32>
    %252 = arith.mulf %251, %251 : vector<32x32xf32>
    %cst_95 = arith.constant dense<0.000000e+00> : vector<32xf32>
    %253 = vector.multi_reduction <add>, %252, %cst_95 [1] : vector<32x32xf32> to vector<32xf32>
    %254 = vector.shape_cast %253 : vector<32xf32> to vector<32x1xf32>
    %cst_96 = arith.constant 3.200000e+01 : f32
    %255 = vector.broadcast %cst_96 : f32 to vector<32x1xf32>
    %256 = arith.divf %254, %255 : vector<32x1xf32>
    %cst_97 = arith.constant 9.99999974E-6 : f32
    %257 = vector.broadcast %cst_97 : f32 to vector<32x1xf32>
    %258 = arith.addf %256, %257 : vector<32x1xf32>
    %259 = math.rsqrt %258 : vector<32x1xf32>
    %260 = vector.broadcast %259 : vector<32x1xf32> to vector<32x32xf32>
    %261 = arith.mulf %251, %260 : vector<32x32xf32>
    %262 = vector.broadcast %244 : vector<1x32xf32> to vector<32x32xf32>
    %263 = arith.mulf %261, %262 : vector<32x32xf32>
    %264 = vector.broadcast %245 : vector<1x32xf32> to vector<32x32xf32>
    %265 = arith.addf %263, %264 : vector<32x32xf32>
    %266 = vector.extract_strided_slice %265 {offsets = [0, 0], sizes = [8, 32], strides = [1, 1]} : vector<32x32xf32> to vector<8x32xf32>
    %267 = vector.extract_strided_slice %265 {offsets = [0, 0], sizes = [8, 32], strides = [1, 1]} : vector<32x32xf32> to vector<8x32xf32>
    %268 = vector.extract_strided_slice %265 {offsets = [8, 0], sizes = [8, 32], strides = [1, 1]} : vector<32x32xf32> to vector<8x32xf32>
    %269 = arith.addf %266, %268 : vector<8x32xf32>
    %270 = arith.maximumf %267, %268 : vector<8x32xf32>
    %271 = vector.extract_strided_slice %265 {offsets = [16, 0], sizes = [8, 32], strides = [1, 1]} : vector<32x32xf32> to vector<8x32xf32>
    %272 = arith.addf %269, %271 : vector<8x32xf32>
    %273 = arith.maximumf %270, %271 : vector<8x32xf32>
    %274 = vector.extract_strided_slice %265 {offsets = [24, 0], sizes = [8, 32], strides = [1, 1]} : vector<32x32xf32> to vector<8x32xf32>
    %275 = arith.addf %272, %274 : vector<8x32xf32>
    %276 = arith.maximumf %273, %274 : vector<8x32xf32>
    %cst_98 = arith.constant 2.500000e-01 : f32
    %277 = vector.broadcast %cst_98 : f32 to vector<8x32xf32>
    %278 = arith.mulf %275, %277 : vector<8x32xf32>
    %279 = arith.truncf %278 : vector<8x32xf32> to vector<8x32xbf16>
    %c0_99 = arith.constant 0 : index
    %c0_100 = arith.constant 0 : index
    %280 = vector.load %arg12[%c0_99, %c0_100] : memref<32x32xbf16, #tpu.memory_space<vmem>>, vector<32x32xbf16>
    %cst_101 = arith.constant dense<0.000000e+00> : vector<8x32xf32>
    %281 = tpu.matmul %279, %280, %cst_101 {dimension_numbers = #tpu.dot_dimension_numbers<[1], [0], [0], [1], [0, 0, 1, 1], [], []>} : vector<8x32xbf16>, vector<32x32xbf16>, vector<8x32xf32> -> vector<8x32xf32>
    %282 = arith.truncf %276 : vector<8x32xf32> to vector<8x32xbf16>
    %c0_102 = arith.constant 0 : index
    %c0_103 = arith.constant 0 : index
    %283 = vector.load %arg13[%c0_102, %c0_103] : memref<32x32xbf16, #tpu.memory_space<vmem>>, vector<32x32xbf16>
    %cst_104 = arith.constant dense<0.000000e+00> : vector<8x32xf32>
    %284 = tpu.matmul %282, %283, %cst_104 {dimension_numbers = #tpu.dot_dimension_numbers<[1], [0], [0], [1], [0, 0, 1, 1], [], []>} : vector<8x32xbf16>, vector<32x32xbf16>, vector<8x32xf32> -> vector<8x32xf32>
    %285 = arith.addf %281, %284 : vector<8x32xf32>
    %c0_105 = arith.constant 0 : index
    %c0_106 = arith.constant 0 : index
    %286 = vector.load %arg14[%c0_105, %c0_106] : memref<1x32xf32, #tpu.memory_space<vmem>>, vector<1x32xf32>
    %287 = vector.broadcast %286 : vector<1x32xf32> to vector<8x32xf32>
    %288 = arith.addf %285, %287 : vector<8x32xf32>
    %c0_107 = arith.constant 0 : index
    %c0_108 = arith.constant 0 : index
    %289 = vector.load %arg17[%c0_107, %c0_108] : memref<8x32xf32, #tpu.memory_space<vmem>>, vector<8x32xf32>
    tpu.vector_store %arg17[%c0_107, %c0_108], %288 {strides = array<i32>} : memref<8x32xf32, #tpu.memory_space<vmem>>, vector<8x32xf32>,
    return
  }
  func.func @transform_0(%arg0: i32) -> (i32, i32, i32) {
    %c0_i32 = arith.constant 0 : i32
    %c0_i32_0 = arith.constant 0 : i32
    %c0_i32_1 = arith.constant 0 : i32
    return %c0_i32, %arg0, %c0_i32_0 : i32, i32, i32
  }
  func.func @transform_1(%arg0: i32) -> (i32, i32) {
    %c0_i32 = arith.constant 0 : i32
    %c0_i32_0 = arith.constant 0 : i32
    %c0_i32_1 = arith.constant 0 : i32
    return %c0_i32, %c0_i32_0 : i32, i32
  }
  func.func @transform_2(%arg0: i32) -> (i32, i32) {
    %c0_i32 = arith.constant 0 : i32
    %c0_i32_0 = arith.constant 0 : i32
    %c0_i32_1 = arith.constant 0 : i32
    return %c0_i32, %c0_i32_0 : i32, i32
  }
  func.func @transform_3(%arg0: i32) -> (i32, i32) {
    %c0_i32 = arith.constant 0 : i32
    %c0_i32_0 = arith.constant 0 : i32
    %c0_i32_1 = arith.constant 0 : i32
    return %c0_i32, %c0_i32_0 : i32, i32
  }
  func.func @transform_4(%arg0: i32) -> (i32, i32) {
    %c0_i32 = arith.constant 0 : i32
    %c0_i32_0 = arith.constant 0 : i32
    %c0_i32_1 = arith.constant 0 : i32
    return %c0_i32, %c0_i32_0 : i32, i32
  }
  func.func @transform_5(%arg0: i32) -> (i32, i32) {
    %c0_i32 = arith.constant 0 : i32
    %c0_i32_0 = arith.constant 0 : i32
    %c0_i32_1 = arith.constant 0 : i32
    return %c0_i32, %c0_i32_0 : i32, i32
  }
  func.func @transform_6(%arg0: i32) -> (i32, i32) {
    %c0_i32 = arith.constant 0 : i32
    %c0_i32_0 = arith.constant 0 : i32
    %c0_i32_1 = arith.constant 0 : i32
    return %c0_i32, %c0_i32_0 : i32, i32
  }
  func.func @transform_7(%arg0: i32) -> (i32, i32) {
    %c0_i32 = arith.constant 0 : i32
    %c0_i32_0 = arith.constant 0 : i32
    %c0_i32_1 = arith.constant 0 : i32
    return %c0_i32, %c0_i32_0 : i32, i32
  }
  func.func @transform_8(%arg0: i32) -> (i32, i32) {
    %c0_i32 = arith.constant 0 : i32
    %c0_i32_0 = arith.constant 0 : i32
    %c0_i32_1 = arith.constant 0 : i32
    return %c0_i32, %c0_i32_0 : i32, i32
  }
  func.func @transform_9(%arg0: i32) -> (i32, i32) {
    %c0_i32 = arith.constant 0 : i32
    %c0_i32_0 = arith.constant 0 : i32
    %c0_i32_1 = arith.constant 0 : i32
    return %c0_i32, %c0_i32_0 : i32, i32
  }
  func.func @transform_10(%arg0: i32) -> (i32, i32) {
    %c0_i32 = arith.constant 0 : i32
    %c0_i32_0 = arith.constant 0 : i32
    %c0_i32_1 = arith.constant 0 : i32
    return %c0_i32, %c0_i32_0 : i32, i32
  }
  func.func @transform_11(%arg0: i32) -> (i32, i32) {
    %c0_i32 = arith.constant 0 : i32
    %c0_i32_0 = arith.constant 0 : i32
    %c0_i32_1 = arith.constant 0 : i32
    return %c0_i32, %c0_i32_0 : i32, i32
  }
  func.func @transform_12(%arg0: i32) -> (i32, i32) {
    %c0_i32 = arith.constant 0 : i32
    %c0_i32_0 = arith.constant 0 : i32
    %c0_i32_1 = arith.constant 0 : i32
    return %c0_i32, %c0_i32_0 : i32, i32
  }
  func.func @transform_13(%arg0: i32) -> (i32, i32) {
    %c0_i32 = arith.constant 0 : i32
    %c0_i32_0 = arith.constant 0 : i32
    %c0_i32_1 = arith.constant 0 : i32
    return %c0_i32, %c0_i32_0 : i32, i32
  }
  func.func @transform_14(%arg0: i32) -> (i32, i32) {
    %c0_i32 = arith.constant 0 : i32
    %c0_i32_0 = arith.constant 0 : i32
    %c0_i32_1 = arith.constant 0 : i32
    return %c0_i32, %c0_i32_0 : i32, i32
  }
  func.func @transform_15(%arg0: i32) -> (i32, i32) {
    %c0_i32 = arith.constant 0 : i32
    %c0_i32_0 = arith.constant 0 : i32
    %c0_i32_1 = arith.constant 0 : i32
    return %c0_i32, %c0_i32_0 : i32, i32
  }
  func.func @transform_16(%arg0: i32) -> (i32, i32) {
    %c0_i32 = arith.constant 0 : i32
    %c0_i32_0 = arith.constant 0 : i32
    return %arg0, %c0_i32 : i32, i32
  }
}

</mosaic_0001>

<bundles_post_ra>
// kernel: tpu_custom_call.1
= control target key start
LH: loop header
LB: loop body
LE: loop exit
PB: predicated region body
PF: predicated region fallthrough
CT: control target
= control target key end

     0   :  { %s5731_s0 = inlined_call_operand.vmem [shape: f32[4,16,32], index: 0, kind: input, shape index: {}]   ;;  %s5732_s1 = inlined_call_operand.vmem [shape: bf16[32,96], index: 1, kind: input, shape index: {}]   ;;  %s5733_s2 = inlined_call_operand.vmem [shape: bf16[32,32], index: 2, kind: input, shape index: {}]   ;;  %s5734_s3 = inlined_call_operand.vmem [shape: bf16[32,128], index: 3, kind: input, shape index: {}]   ;;  %s5735_s4 = inlined_call_operand.vmem [shape: bf16[128,32], index: 4, kind: input, shape index: {}]   ;;  %s5736_s5 = inlined_call_operand.hbm [shape: f32[1,416], index: 5, kind: input, shape index: {}]   ;;  %s5737_s6 = inlined_call_operand.vmem [shape: bf16[32,96], index: 6, kind: input, shape index: {}]   ;;  %s5738_s7 = inlined_call_operand.vmem [shape: bf16[32,32], index: 7, kind: input, shape index: {}]   ;;  %s5739_s8 = inlined_call_operand.vmem [shape: bf16[32,128], index: 8, kind: input, shape index: {}]   ;;  %s5740_s9 = inlined_call_operand.vmem [shape: bf16[128,32], index: 9, kind: input, shape index: {}]   ;;  %s5741_s10 = inlined_call_operand.hbm [shape: f32[1,416], index: 10, kind: input, shape index: {}]   ;;  %s5742_s11 = inlined_call_operand.vmem [shape: bf16[32,32], index: 11, kind: input, shape index: {}]   ;;  %s5743_s12 = inlined_call_operand.hbm [shape: bf16[32,32], index: 12, kind: input, shape index: {}]   ;;  %s5744_s13 = inlined_call_operand.vmem [shape: f32[1,32], index: 13, kind: input, shape index: {}]   ;;  %s5745_s14 = inlined_call_operand.vmem [shape: f32[32,4], index: 14, kind: input, shape index: {}]   ;;  %s5746_s15 = inlined_call_operand.vmem [shape: f32[4,32], index: 15, kind: input, shape index: {}]   ;;  %s5747_s16 = inlined_call_operand.hbm [shape: f32[16,32], index: 16, kind: output, shape index: {}]  }
   0x1   :  { %5758 = sst [smem:[#allocation18_spill]] %s5731_s0 }
   0x2   :  { %5759 = sst [smem:[#allocation19_spill]] %s5736_s5 }
   0x3   :  { %5760 = sst [smem:[#allocation20_spill]] %s5741_s10 }
   0x4   :  { %5761 = sst [smem:[#allocation21_spill]] %s5747_s16 }
   0x5   :  { %21 = vsyncpa [#allocation4], 0 }
   0x6   :  { %22 = vsyncpa [#allocation7], 0 }
   0x7   :  { %23 = vsyncpa [#allocation5], 0 }
   0x8   :  { %25 = vsyncpa [#allocation5 + $0x1], 0  ;;  %s5064_s21 = smov 0   ;;  %s5066_s22 = smov 0  }
   0x9   :  { %s5068_s23 = smov 0   ;;  %s5070_s24 = smov 0  }
   0xa LB: > { %5762 = sst [smem:[#allocation13_spill]] %s4954_s21  ;;  %s5085_s25 = sadd.s32 4294967295, %s4966_s24   ;;  %s4966_s24 = sphi %s5070_s24, %s5787_s24   ;;  %s4962_s23 = sphi %s5068_s23, %s5791_s23   ;;  %s4958_s22 = sphi %s5066_s22, %s5790_s22   ;;  %s4954_s21 = sphi %s5064_s21, %s5789_s21  }
   0xb   : > { %s3979_s26 = sadd.s32 4294967294, %s4966_s24   ;;  %s5089_s27 = sadd.s32 1, %s4966_s24  }
   0xc   : > { %5763 = sst [smem:[#allocation14_spill]] %s5089_s27  ;;  %s38_s28 = sadd.s32 1, %s4962_s23 }
   0xd   : > { %s35_s29 = ssub.s32 %s4966_s24, %s5089_s27  ;;  %p45_p0 = scmp.ne.s32.totalorder %s4962_s23, %s4958_s22 }
   0xe   : > { %p36_p1 = scmp.eq.s32.totalorder %s35_s29, 0  ;;  %p46_p2 = scmp.eq.s32.totalorder %s4966_s24, 0 }
   0xf   : > { %p390_p3 = scmp.eq.s32.totalorder %s5085_s25, 1  ;;  %p395_p4 = scmp.ne.s32.totalorder %s4958_s22, %s4954_s21 }
  0x10   : > { %s5101_s30 = scalar_select %p36_p1, %s4962_s23, %s38_s28  }
  0x11   : > { %p5103_p5 = por %p46_p2, %p45_p0  ;;  %p5107_p6 = por %p390_p3, %p45_p0 }
  0x12   : > { %5764 = sst [smem:[#allocation15_spill]] %s5101_s30  ;;  %p396_p7 = scmp.eq.s32.totalorder %s3979_s26, 1 }
  0x13   : > { %s5765_s0 = scalar_select %p5103_p5, 1, 0 }
  0x14   : > { %s5766_s17 = scalar_select %p5107_p6, 1, 0 }
  0x15   : > { %p3980_p8 = scmp.ge.s32.totalorder %s4966_s24, 1  ;;  %p403_p9 = scmp.lt.s32.totalorder %s4966_s24, 3 }
  0x16   : > { %5767 = sst [smem:[#allocation16_spill]] %s5766_s17  ;;  %p5113_p10 = por %p396_p7, %p395_p4 }
  0x17   : > { %p5752_p11 = scmp.eq.s32.totalorder %s5085_s25, 0  ;;  %p5118_p12 = pnand %p3980_p8, %p403_p9 }
  0x18   : > { %s5768_s18 = scalar_select %p5113_p10, 1, 0 }
  0x19   : > { %s5770_s19 = scalar_select %p5118_p12, 1, 0 }
  0x1a   : > { %5769 = sst [smem:[#allocation17_spill]] %s5768_s18  ;;  %s4968_s20 = smov [#allocation6]  }
  0x1b   : > { %s451_s28 = sshll.u32 %s4968_s20, 4  ;;  %p4608_p13 = pneg %p5118_p12  ;;  %s452_s28 = int_to_ptr.vmem [resolvable:$true] %s451_s28 }
  0x1c   : > { %s4969_s29 = smov [#allocation3]   ;;  %s4970_s27 = smov [#allocation8]  }
  0x1d   : > { %s428_s30 = sshll.u32 %s4969_s29, 4  ;;  %p5126_p0 = pnand %p5752_p11, %p4608_p13  ;;  %s429_s30 = int_to_ptr.vmem [resolvable:$true] %s428_s30 }
  0x1e   : > { %s464_s18 = sshll.u32 %s4970_s27, 4  ;;  %s4831_s20 = scalar_lea.vmem %s452_s28, 64  ;;  %s5130_s18 = int_to_ptr.vmem [resolvable:$true] %s464_s18 }
  0x1f   : > { %p4822_p1 = pneg %p5126_p0  ;;  %p4832_p2 = scmp.ne.s32.totalorder %s452_s28, %s4831_s20 }
  0x20   : > { %p4839_p7 = scmp.lt.s32.totalorder %s452_s28, %s452_s28  ;;  %p4840_p8 = scmp.lt.s32.totalorder %s4831_s20, %s4831_s20 }
  0x21   : > { %p4834_p3 = pnand %p4832_p2, %p4822_p1 }
  0x22   : > { %p4841_p9 = por %p4840_p8, %p4839_p7 }
  0x23   : > { %p4835_p4 = pneg %p4834_p3 }
  0x25   : > { %p4842_p13 = pnand %p4841_p9, %p4835_p4 }
  0x27   : > { %4845 = shalt.err (!%p4842_p13)
}
  0x28   : > { %s5772_s10 = sld [smem:[#allocation20_spill]]  ;;  %s4857_s27 = scalar_lea.vmem %s429_s30, 64 }
  0x29   : > { %p4858_p11 = scmp.ne.s32.totalorder %s429_s30, %s4857_s27  ;;  %p4865_p2 = scmp.lt.s32.totalorder %s429_s30, %s429_s30 }
  0x2a   : > { %p4866_p3 = scmp.lt.s32.totalorder %s4857_s27, %s4857_s27 }
  0x2b   : > { %p4860_p10 = pnand %p4858_p11, %p4822_p1 }
  0x2c   : > { %p4867_p12 = por %p4866_p3, %p4865_p2 }
  0x2d   : > { %p4861_p6 = pneg %p4860_p10 }
  0x2e   : > { %4614 = dma.hbm_to_vmem [thread:$0]  (!%p5126_p0), %s5772_s10, 64, %s452_s28, [#allocation7]  }
  0x2f   : > { %p4868_p5 = pnand %p4867_p12, %p4861_p6 }
  0x31   : > { %4871 = shalt.err (!%p4868_p5)
}
  0x32   : > { %s5773_s5 = sld [smem:[#allocation19_spill]]  ;;  %s4883_s21 = scalar_lea.vmem %s5130_s18, 256 }
  0x33   : > { %p4884_p4 = scmp.ne.s32.totalorder %s5130_s18, %s4883_s21  ;;  %p4891_p7 = scmp.lt.s32.totalorder %s5130_s18, %s5130_s18 }
  0x34   : > { %p4892_p6 = scmp.lt.s32.totalorder %s4883_s21, %s4883_s21 }
  0x35   : > { %p4886_p10 = pnand %p4884_p4, %p4822_p1 }
  0x36   : > { %p4893_p5 = por %p4892_p6, %p4891_p7 }
  0x37   : > { %p4887_p11 = pneg %p4886_p10 }
  0x38   : > { %4611 = dma.hbm_to_vmem [thread:$0]  (!%p5126_p0), %s5773_s5, 64, %s429_s30, [#allocation4]  }
  0x39   : > { %p4894_p12 = pnand %p4893_p5, %p4887_p11 }
  0x3b   : > { %4897 = shalt.err (!%p4894_p12)
}
  0x3c   : > { %s4971_s28 = smov 64   ;;  %s4972_s16 = smov 4  }
  0x3d   : > { %4617 = dma.hbm_to_vmem [thread:$0]  (!%p5126_p0), %s5743_s12, 256, %s5130_s18, [#allocation7], %s4971_s28, %s4971_s28, %s4972_s16  }
  0x3e   : > { %p3984_p8 = scmp.ge.s32.totalorder %s4966_s24, 2 }
  0x3f   : > { %p5774_p1 = scmp.ne.s32.totalorder (!%p3984_p8), %s5765_s0, 0 }
  0x40   : > { %483 = sbr.rel (%p3984_p8) target bundleno = 81 (0x51), region = 76 }
  0x45   : > { %486 = sbr.rel (!%p5774_p1) target bundleno = 81 (0x51), region = 80  ;;  %s488_s30 = sand.u32 (%p5774_p1), 1, %s4962_s23  }
  0x46   : > { %s3986_s20 = sshll.u32 (%p5774_p1), %s4966_s24, 3  ;;  %s3985_s21 = sshll.u32 (%p5774_p1), %s488_s30, 5 }
  0x47   : > { %s5775_s26 = sld [smem:[#allocation18_spill]] (%p5774_p1)  ;;  %s490_s18 = scalar_lea.vmem (%p5774_p1), [#allocation2], %s3985_s21 }
  0x4d   : > { %s492_s17 = scalar_lea.vmem %s5775_s26, %s3986_s20 }
  0x4e   : > { %v527_v0 = vld [vmem:[%s492_s17] sm:$0xff]  ;;  %v529_v1 = vld [vmem:[%s492_s17 + $0x10] sm:$0xff] }
  0x4f   : > { %v531_v2 = vld [vmem:[%s492_s17 + $0x20] sm:$0xff]  ;;  %528 = vst [vmem:[%s490_s18] sm:$0xff] %v527_v0  ;;  %530 = vst [vmem:[%s490_s18 + $0x8] sm:$0xff] %v529_v1  ;;  %v533_v3 = vld [vmem:[%s492_s17 + $0x30] sm:$0xff] }
  0x50   : > { %532 = vst [vmem:[%s490_s18 + $0x10] sm:$0xff] %v531_v2  ;;  %534 = vst [vmem:[%s490_s18 + $0x18] sm:$0xff] %v533_v3 }
  0x51 PF: > { %p5776_p0 = scmp.ne.s32.totalorder %s5770_s19, 0 }
  0x52   : > { %s5176_s0 = sand.u32 (!%p5776_p0), 1, %s4958_s22   ;;  %p5777_p9 = scmp.eq.s32.totalorder (!%p5776_p0), %s5085_s25, 0 }
  0x53   : > { %543 = sbr.rel (%p5776_p0) target bundleno = 4359 (0x1107), region = 118  ;;  %s3988_s5 = sshll.u32 (!%p5776_p0), %s5176_s0, 5 }
  0x54   : > { %s548_s10 = scalar_lea.vmem (!%p5776_p0), [#allocation2], %s3988_s5 }
  0x58   : > { %4941 = dma.done.wait (%p5777_p9), [#allocation4], 64   ;;  %p5778_p13 = pmov %p5777_p9 }
  0x59   : > { %p5779_p2 = pmov %p5777_p9 }
  0x5a   : > { %4943 = vsyncadd (%p5778_p13), [#allocation4], 4294967232 }
  0x5b   : > { %4945 = dma.done.wait (%p5779_p2), [#allocation7], 320   ;;  %p5780_p3 = pmov %p5779_p2 }
  0x5c   : > { %v4671_v4 = vld [vmem:[%s5732_s1 + $0x8] sm:$0xff]   ;;  %v4672_v5 = vld [vmem:[%s5732_s1] sm:$0xff]   ;;  %vm642_vm0 = vcmask 261120   ;;  %v5197_v8 = vld [vmem:[%s548_s10 + $0x10] sm:$0xff]  ;;  %s4974_s17 = smov 64   ;;  %vm1159_vm1 = vcmask 1043456  }
  0x5d   : > { %4947 = vsyncadd (%p5780_p3), [#allocation7], 4294966976  ;;  %4298 = vmatprep.subr.bf16.mxu1 %v4671_v4  ;;  %v5193_v6 = vld [vmem:[%s548_s10] sm:$0xff]  ;;  %v5195_v7 = vld [vmem:[%s548_s10 + $0x8] sm:$0xff]  ;;  %vm1146_vm2 = vcmask 31744   ;;  %s4975_s20 = smov 32  }
  0x5e   : > { %4299 = vmatpush3.bf16.msra.mxu1 %v4671_v4  ;;  %v617_v9 = vpack.c.bf16 %v5195_v7, %v5193_v6  ;;  %v5201_v10 = vld [vmem:[%s548_s10 + $0x18] sm:$0xff]  ;;  %v5219_v13 = vld [vmem:[%s5745_s14 + $0x10] sm:$0xff]  ;;  %v5227_v14 = vld [vmem:[%s5745_s14 + $0x8] sm:$0xff]  ;;  %s4973_s10 = smov 96   ;;  %vm1919_vm3 = vcmask 523264   ;;  %vm4977_vm4 = vmmov 0  }
  0x5f   : > { %4300 = vmatprep.subr.bf16.mxu1 %v4672_v5  ;;  %v618_v11 = vpack.c.bf16 %v5201_v10, %v5197_v8  ;;  %v5210_v12 = vld [vmem:[%s5745_s14 + $0x18] sm:$0xff]  ;;  %v5236_v15 = vld [vmem:[%s5745_s14] sm:$0xff]  ;;  %s3992_s27 = sshll.u32 %s5176_s0, 3  ;;  %s5781_s26 = sld [smem:[#allocation16_spill]] }
  0x60   : > { %4302 = vmatprep.mubr.msk.bf16.mxu1 %vm642_vm0, %v617_v9  ;;  %4320 = vmatprep.subr.mxu0 %v5210_v12  ;;  %v5245_v16 = vld [vmem:[#allocation3] ss:$0 sm:$0xff]  ;;  %s4131_s18 = sshll.u32 %s5085_s25, 7  ;;  %s606_s5 = scalar_lea.vmem [#allocation9], %s3992_s27 }
  0x61   : > { %4321 = vmatpush3.msra.mxu0 %v5210_v12  ;;  %v5292_v45 = vld [vmem:[%s5746_s15] sm:$0xf]  ;;  %s3883_s19 = sshll.u32 %s606_s5, 4  ;;  %s3870_s25 = scalar_lea.sflag [#allocation5], %s5176_s0  ;;  %s5689_s19 = int_to_ptr.vmem [resolvable:$true] %s3883_s19 }
  0x62   : > { %4301 = vmatpush3.bf16.msra.mxu1 %v4672_v5  ;;  %4322 = vmatprep.subr.mxu0 %v5219_v13  ;;  %s4898_s16 = scalar_lea.vmem %s5689_s19, 128  ;;  %s4978_s29 = smov [#allocation9]  }
  0x63   : > { %4306 = vmatprep.subr.mxu1 %v5210_v12  ;;  %4323 = vmatpush3.msra.mxu0 %v5219_v13  ;;  %p4899_p4 = scmp.ne.s32.totalorder %s5689_s19, %s4898_s16  ;;  %s4902_s27 = sshll.u32 %s4978_s29, 4  ;;  %s4903_s27 = int_to_ptr.vmem [resolvable:$false] %s4902_s27 }
  0x64   : > { %4324 = vmatprep.subr.mxu0 %v5227_v14  ;;  %s4904_s30 = scalar_lea.vmem %s4903_s27, 256  ;;  %p4905_p6 = scmp.lt.s32.totalorder %s5689_s19, %s4903_s27 }
  0x65   : > { %4303 = vmatmul.mubr.msk.bf16.vlgmr.msra.gmra.mxu1 %vm642_vm0, %v618_v11  ;;  %4325 = vmatpush3.msra.mxu0 %v5227_v14  ;;  %p5783_p10 = scmp.ne.s32.totalorder %s5781_s26, 0  ;;  %p4906_p5 = scmp.lt.s32.totalorder %s4904_s30, %s4898_s16 }
  0x66   : > { %4307 = vmatpush3.msra.mxu1 %v5210_v12  ;;  %4326 = vmatprep.subr.mxu0 %v5236_v15 }
  0x67   : > { %4308 = vmatprep.subr.mxu1 %v5219_v13  ;;  %4327 = vmatpush3.msra.mxu0 %v5236_v15  ;;  %p4900_p11 = pnand %p4899_p4, %p5783_p10  ;;  %p4907_p12 = por %p4906_p5, %p4905_p6 }
  0x68   : > { %4309 = vmatpush3.msra.mxu1 %v5219_v13  ;;  %4348 = vmatprep.subr.mxu0 %v5210_v12 }
  0x69   : > { %4310 = vmatprep.subr.mxu1 %v5227_v14  ;;  %p4901_p7 = pneg %p4900_p11 }
  0x6a   : > { %4311 = vmatpush3.msra.mxu1 %v5227_v14 }
  0x6b   : > { %4312 = vmatprep.subr.mxu1 %v5236_v15  ;;  %p4908_p1 = pnand %p4907_p12, %p4901_p7 }
  0x6c   : > { %4313 = vmatpush3.msra.mxu1 %v5236_v15 }
  0x6d   : > { %4334 = vmatprep.subr.mxu1 %v5210_v12 }
 0x125   : > { %v4304_v17 = vpop.f32.mrf.mxu1 }
 0x126   : > { %v692_v18 = vadd.f32 %v4304_v17, %v5245_v16 }
 0x127   : > { %v683_v19 = vpop.f32.mrf.mxu1 }
 0x128   : > { %v684_v20 = vadd.f32 %v5245_v16, %v683_v19  ;;  %909 = vrot.lane.b32.xlu1 %v692_v18, %s4973_s10 }
 0x129   : > { %v4305_v21 = vpop.f32.mrf.mxu1 }
 0x12a   : > { %v695_v22 = vadd.f32 %v4305_v21, %v5245_v16  ;;  %699 = vrot.lane.b32.xlu0 %v684_v20, %s4973_s10 }
 0x12b   : > { %v686_v23 = vpop.f32.mrf.mxu1 }
 0x12c   : > { %v687_v24 = vadd.f32 %v5245_v16, %v686_v23  ;;  %1014 = vrot.lane.b32.xlu1 %v695_v22, %s4973_s10 }
 0x12e   : > { %804 = vrot.lane.b32.xlu0 %v687_v24, %s4973_s10 }
 0x130   : > { %1372 = vrot.lane.b32.xlu1 %v687_v24, %s4974_s17 }
 0x132   : > { %1248 = vrot.lane.b32.xlu0 %v684_v20, %s4974_s17 }
 0x134   : > { %1620 = vrot.lane.b32.xlu1 %v695_v22, %s4974_s17 }
 0x136   : > { %1496 = vrot.lane.b32.xlu0 %v692_v18, %s4974_s17 }
 0x13a   : > { %1754 = vrot.lane.b32.xlu0 %v5245_v16, %s4975_s20 }
 0x19a   : > { %v910_v31 = vpop.permute.xlu1 %909 }
 0x19b   : > { %v912_v35 = vmul.f32 %v910_v31, %v684_v20  ;;  %v913_v38 = vmul.f32 %v910_v31, %v687_v24  ;;  %v914_v39 = vmul.f32 %v910_v31, %v692_v18  ;;  %v915_v42 = vmul.f32 %v910_v31, %v695_v22 }
 0x19c   : > { %v700_v25 = vpop.permute.xlu0 %699 }
 0x19d   : > { %v702_v26 = vmul.f32 %v700_v25, %v684_v20  ;;  %v703_v27 = vmul.f32 %v700_v25, %v687_v24  ;;  %v704_v28 = vmul.f32 %v700_v25, %v692_v18  ;;  %v705_v32 = vmul.f32 %v700_v25, %v695_v22 }
 0x19e   : > { %v1015_v36 = vpop.permute.xlu1 %1014 }
 0x19f   : > { %4314 = vmatprep.mubr.msk.f32.mxu1 %vm642_vm0, %v702_v26  ;;  %v1017_v40 = vmul.f32 %v1015_v36, %v684_v20  ;;  %v1018_v41 = vmul.f32 %v1015_v36, %v687_v24  ;;  %v1019_v43 = vmul.f32 %v1015_v36, %v692_v18  ;;  %v1020_v44 = vmul.f32 %v1015_v36, %v695_v22 }
 0x1a0   : > { %v805_v29 = vpop.permute.xlu0 %804  ;;  %4315 = vmatmul.mubr.msk.f32.vlgmr.msra.gmra.mxu1 %vm642_vm0, %v703_v27 }
 0x1a1   : > { %v808_v30 = vmul.f32 %v805_v29, %v687_v24  ;;  %4317 = vmatprep.mubr.msk.f32.mxu1 %vm642_vm0, %v704_v28  ;;  %4335 = vmatpush3.msra.mxu1 %v5210_v12  ;;  %v807_v33 = vmul.f32 %v805_v29, %v684_v20  ;;  %v809_v34 = vmul.f32 %v805_v29, %v692_v18 }
 0x1a2   : > { %4336 = vmatprep.subr.mxu1 %v5219_v13  ;;  %v810_v37 = vmul.f32 %v805_v29, %v695_v22 }
 0x1a3   : > { %4337 = vmatpush3.msra.mxu1 %v5219_v13  ;;  %4328 = vmatprep.mubr.msk.f32.mxu0 %vm642_vm0, %v807_v33 }
 0x1a4   : > { %4318 = vmatmul.mubr.msk.f32.gmra.mxu1 %vm642_vm0, %v705_v32  ;;  %4329 = vmatmul.mubr.msk.f32.vlgmr.msra.gmra.mxu0 %vm642_vm0, %v808_v30 }
 0x1a5   : > { %4338 = vmatprep.subr.mxu1 %v5227_v14  ;;  %4349 = vmatpush3.msra.mxu0 %v5210_v12 }
 0x1a6   : > { %4331 = vmatprep.mubr.msk.f32.mxu0 %vm642_vm0, %v809_v34  ;;  %4339 = vmatpush3.msra.mxu1 %v5227_v14 }
 0x1a7   : > { %4342 = vmatprep.mubr.msk.f32.mxu1 %vm642_vm0, %v912_v35  ;;  %4350 = vmatprep.subr.mxu0 %v5219_v13 }
 0x1a8   : > { %4340 = vmatprep.subr.mxu1 %v5236_v15  ;;  %4351 = vmatpush3.msra.mxu0 %v5219_v13 }
 0x1a9   : > { %4341 = vmatpush3.msra.mxu1 %v5236_v15  ;;  %4352 = vmatprep.subr.mxu0 %v5227_v14 }
 0x1aa   : > { %4332 = vmatmul.mubr.msk.f32.gmra.mxu0 %vm642_vm0, %v810_v37  ;;  %4343 = vmatmul.mubr.msk.f32.vlgmr.msra.gmra.mxu1 %vm642_vm0, %v913_v38 }
 0x1ab   : > { %4353 = vmatpush3.msra.mxu0 %v5227_v14  ;;  %4345 = vmatprep.mubr.msk.f32.mxu1 %vm642_vm0, %v914_v39 }
 0x1ac   : > { %4354 = vmatprep.subr.mxu0 %v5236_v15  ;;  %4356 = vmatprep.mubr.msk.f32.mxu0 %vm642_vm0, %v1017_v40 }
 0x1ad   : > { %4355 = vmatpush3.msra.mxu0 %v5236_v15  ;;  %4362 = vmatprep.subr.msk.mxu1 %vm1159_vm1, %v5292_v45 }
 0x1ae   : > { %4357 = vmatmul.mubr.msk.f32.vlgmr.msra.gmra.mxu0 %vm642_vm0, %v1018_v41  ;;  %4346 = vmatmul.mubr.msk.f32.gmra.mxu1 %vm642_vm0, %v915_v42 }
 0x1af   : > { %4359 = vmatprep.mubr.msk.f32.mxu0 %vm642_vm0, %v1019_v43  ;;  %4370 = vmatprep.subr.msk.mxu0 %vm1159_vm1, %v5292_v45 }
 0x1b0   : > { %4363 = vmatpush3.msk.msra.mxu1 %vm1159_vm1, %v5292_v45  ;;  %4371 = vmatpush3.msk.msra.mxu0 %vm1159_vm1, %v5292_v45 }
 0x1b1   : > { %4378 = vmatprep.subr.msk.mxu1 %vm1159_vm1, %v5292_v45  ;;  %4386 = vmatprep.subr.msk.mxu0 %vm1159_vm1, %v5292_v45 }
 0x1b2   : > { %4360 = vmatmul.mubr.msk.f32.gmra.mxu0 %vm642_vm0, %v1020_v44 }
 0x260   : > { %v4316_v46 = vpop.f32.mrf.mxu1 }
 0x262   : > { %v784_v47 = vpop.f32.mrf.mxu1 }
 0x264   : > { %v4319_v48 = vpop.f32.mrf.mxu1  ;;  %v4330_v49 = vpop.f32.mrf.mxu0 }
 0x265   : > { %v1119_v53 = vmax.f32 %v4316_v46, %v4330_v49 }
 0x266   : > { %v794_v50 = vpop.f32.mrf.mxu1  ;;  %v889_v51 = vpop.f32.mrf.mxu0 }
 0x267   : > { %v1118_v58 = vmax.f32 %v784_v47, %v889_v51 }
 0x26a   : > { %v4333_v52 = vpop.f32.mrf.mxu0  ;;  %v4344_v54 = vpop.f32.mrf.mxu1 }
 0x26b   : > { %v1123_v56 = vmax.f32 %v1119_v53, %v4344_v54  ;;  %v1121_v59 = vmax.f32 %v4319_v48, %v4333_v52 }
 0x26c   : > { %v899_v55 = vpop.f32.mrf.mxu0  ;;  %v994_v57 = vpop.f32.mrf.mxu1 }
 0x26d   : > { %v1122_v63 = vmax.f32 %v1118_v58, %v994_v57  ;;  %v1120_v9 = vmax.f32 %v794_v50, %v899_v55 }
 0x26e   : > { %v4358_v60 = vpop.f32.mrf.mxu0  ;;  %v4347_v61 = vpop.f32.mrf.mxu1 }
 0x26f   : > { %v1127_v62 = vmax.f32 %v1123_v56, %v4358_v60  ;;  %v1125_v0 = vmax.f32 %v1121_v59, %v4347_v61 }
 0x270   : > { %v1099_v1 = vpop.f32.mrf.mxu0  ;;  %v1004_v11 = vpop.f32.mrf.mxu1 }
 0x271   : > { %v1131_v2 = vsub.f32 %v4316_v46, %v1127_v62  ;;  %v1260_v3 = vsub.f32 %v4330_v49, %v1127_v62  ;;  %v1384_v4 = vsub.f32 %v4344_v54, %v1127_v62  ;;  %v1508_v5 = vsub.f32 %v4358_v60, %v1127_v62 }
 0x272   : > { %v1126_v17 = vmax.f32 %v1122_v63, %v1099_v1  ;;  %v4361_v18 = vpop.f32.mrf.mxu0  ;;  %v1124_v27 = vmax.f32 %v1120_v9, %v1004_v11 }
 0x273   : > { %v1136_v19 = vmul.f32 1.442695, %v1131_v2  ;;  %v1265_v20 = vmul.f32 1.442695, %v1260_v3  ;;  %v1389_v21 = vmul.f32 1.442695, %v1384_v4  ;;  %v1129_v22 = vmax.f32 %v1125_v0, %v4361_v18 }
 0x274   : > { %v1513_v23 = vmul.f32 1.442695, %v1508_v5  ;;  %v1130_v24 = vsub.f32 %v784_v47, %v1126_v17  ;;  %v1259_v25 = vsub.f32 %v889_v51, %v1126_v17  ;;  %v1383_v26 = vsub.f32 %v994_v57, %v1126_v17  ;;  %v1109_v30 = vpop.f32.mrf.mxu0 }
 0x275   : > { %4703 = vpow2.f32 %v1136_v19  ;;  %v1507_v28 = vsub.f32 %v1099_v1, %v1126_v17  ;;  %v1133_v29 = vsub.f32 %v4319_v48, %v1129_v22  ;;  %v1262_v33 = vsub.f32 %v4333_v52, %v1129_v22 }
 0x276   : > { %4705 = vpow2.f32 %v1265_v20  ;;  %v1134_v31 = vmul.f32 1.442695, %v1130_v24  ;;  %v1263_v32 = vmul.f32 1.442695, %v1259_v25  ;;  %v1387_v34 = vmul.f32 1.442695, %v1383_v26 }
 0x277   : > { %4707 = vpow2.f32 %v1389_v21  ;;  %v1511_v35 = vmul.f32 1.442695, %v1507_v28  ;;  %v1386_v36 = vsub.f32 %v4347_v61, %v1129_v22  ;;  %v1128_v37 = vmax.f32 %v1124_v27, %v1109_v30 }
 0x278   : > { %4709 = vpow2.f32 %v1513_v23  ;;  %v1140_v38 = vmul.f32 1.442695, %v1133_v29  ;;  %v1269_v39 = vmul.f32 1.442695, %v1262_v33  ;;  %v1510_v44 = vsub.f32 %v4361_v18, %v1129_v22  ;;  %v4673_v29 = vld [vmem:[%s5733_s2 + $0x8] sm:$0xff]  }
 0x279   : > { %4711 = vpow2.f32 %v1134_v31  ;;  %v1132_v40 = vsub.f32 %v794_v50, %v1128_v37  ;;  %v1261_v41 = vsub.f32 %v899_v55, %v1128_v37  ;;  %v1393_v42 = vmul.f32 1.442695, %v1386_v36 }
 0x27a   : > { %4713 = vpow2.f32 %v1263_v32  ;;  %v1385_v43 = vsub.f32 %v1004_v11, %v1128_v37  ;;  %v1509_v48 = vsub.f32 %v1109_v30, %v1128_v37  ;;  %v1517_v51 = vmul.f32 1.442695, %v1510_v44  ;;  %v4674_v30 = vld [vmem:[%s5733_s2] sm:$0xff]  }
 0x27b   : > { %4715 = vpow2.f32 %v1387_v34  ;;  %v1138_v46 = vmul.f32 1.442695, %v1132_v40  ;;  %v1267_v47 = vmul.f32 1.442695, %v1261_v41 }
 0x27c   : > { %4717 = vpow2.f32 %v1511_v35  ;;  %v1391_v49 = vmul.f32 1.442695, %v1385_v43  ;;  %v1515_v53 = vmul.f32 1.442695, %v1509_v48  ;;  %v1249_v35 = vpop.permute.xlu0 %1248 }
 0x27d   : > { %4719 = vpow2.f32 %v1140_v38 }
 0x27e   : > { %4721 = vpow2.f32 %v1269_v39  ;;  %v1373_v39 = vpop.permute.xlu1 %1372 }
 0x27f   : > { %4723 = vpow2.f32 %v1393_v42 }
 0x280   : > { %4725 = vpow2.f32 %v1138_v46 }
 0x281   : > { %4727 = vpow2.f32 %v1267_v47  ;;  %v1497_v47 = vpop.permute.xlu0 %1496 }
 0x282   : > { %v4704_v52 = vpop.eup %4703  ;;  %4729 = vpow2.f32 %v1391_v49 }
 0x283   : > { %v4706_v54 = vpop.eup %4705  ;;  %4731 = vpow2.f32 %v1517_v51 }
 0x284   : > { %v4708_v50 = vpop.eup %4707  ;;  %v1272_v56 = vadd.f32 %v4706_v54, %v4704_v52  ;;  %4733 = vpow2.f32 %v1515_v53 }
 0x285   : > { %v4710_v55 = vpop.eup %4709 }
 0x286   : > { %v4712_v57 = vpop.eup %4711  ;;  %v1396_v59 = vadd.f32 %v4708_v50, %v1272_v56 }
 0x287   : > { %v4714_v58 = vpop.eup %4713  ;;  %4364 = vmatprep.mubr.msk.f32.mxu1 %vm1146_vm2, %v4712_v57 }
 0x288   : > { %v4716_v60 = vpop.eup %4715  ;;  %v1271_v61 = vadd.f32 %v4714_v58, %v4712_v57  ;;  %4372 = vmatprep.mubr.msk.f32.mxu0 %vm1146_vm2, %v4714_v58  ;;  %4365 = vmatmul.mubr.msk.f32.vlgmr.msra.gmra.mxu1 %vm1146_vm2, %v4704_v52  ;;  %v1520_v2 = vadd.f32 %v4710_v55, %v1396_v59  ;;  %v1621_v57 = vpop.permute.xlu1 %1620 }
 0x289   : > { %v4718_v62 = vpop.eup %4717  ;;  %4373 = vmatmul.mubr.msk.f32.vlgmr.msra.gmra.mxu0 %vm1146_vm2, %v4706_v54  ;;  %4379 = vmatpush3.msk.msra.mxu1 %vm1159_vm1, %v5292_v45 }
 0x28a   : > { %v4720_v63 = vpop.eup %4719  ;;  %v1395_v0 = vadd.f32 %v4716_v60, %v1271_v61  ;;  %4387 = vmatpush3.msk.msra.mxu0 %vm1159_vm1, %v5292_v45  ;;  %4394 = vmatprep.subr.msk.mxu1 %vm1159_vm1, %v5292_v45 }
 0x28b   : > { %v4722_v1 = vpop.eup %4721  ;;  %4402 = vmatprep.subr.bf16.mxu0 %v4673_v29 }
 0x28c   : > { %v1519_v3 = vadd.f32 %v4718_v62, %v1395_v0  ;;  %v1274_v4 = vadd.f32 %v4722_v1, %v4720_v63  ;;  %v4724_v5 = vpop.eup %4723 }
 0x28d   : > { %v4726_v9 = vpop.eup %4725 }
 0x28e   : > { %4735 = vrcp.f32 %v1519_v3  ;;  %v4728_v11 = vpop.eup %4727  ;;  %v1398_v17 = vadd.f32 %v4724_v5, %v1274_v4  ;;  %4367 = vmatprep.mubr.msk.f32.mxu1 %vm1146_vm2, %v4726_v9 }
 0x28f   : > { %4737 = vrcp.f32 %v1520_v2  ;;  %v1273_v18 = vadd.f32 %v4728_v11, %v4726_v9  ;;  %4375 = vmatprep.mubr.msk.f32.mxu0 %vm1146_vm2, %v4728_v11  ;;  %4368 = vmatmul.mubr.msk.f32.gmra.mxu1 %vm1146_vm2, %v4720_v63  ;;  %v4730_v19 = vpop.eup %4729 }
 0x290   : > { %4376 = vmatmul.mubr.msk.f32.gmra.mxu0 %vm1146_vm2, %v4722_v1  ;;  %4380 = vmatprep.mubr.msk.f32.mxu1 %vm1146_vm2, %v4716_v60  ;;  %v4732_v20 = vpop.eup %4731 }
 0x291   : > { %v1397_v21 = vadd.f32 %v4730_v19, %v1273_v18  ;;  %4388 = vmatprep.mubr.msk.f32.mxu0 %vm1146_vm2, %v4718_v62  ;;  %v4734_v22 = vpop.eup %4733  ;;  %v1522_v23 = vadd.f32 %v4732_v20, %v1398_v17 }
 0x293   : > { %v1521_v24 = vadd.f32 %v4734_v22, %v1397_v21  ;;  %4381 = vmatmul.mubr.msk.f32.vlgmr.msra.gmra.mxu1 %vm1146_vm2, %v4708_v50 }
 0x294   : > { %4389 = vmatmul.mubr.msk.f32.vlgmr.msra.gmra.mxu0 %vm1146_vm2, %v4710_v55  ;;  %4383 = vmatprep.mubr.msk.f32.mxu1 %vm1146_vm2, %v4730_v19 }
 0x295   : > { %4739 = vrcp.f32 %v1521_v24  ;;  %4391 = vmatprep.mubr.msk.f32.mxu0 %vm1146_vm2, %v4734_v22  ;;  %4395 = vmatpush3.msk.msra.mxu1 %vm1159_vm1, %v5292_v45 }
 0x296   : > { %4741 = vrcp.f32 %v1522_v23  ;;  %4403 = vmatpush3.bf16.msra.mxu0 %v4673_v29 }
 0x297   : > { %4384 = vmatmul.mubr.msk.f32.gmra.mxu1 %vm1146_vm2, %v4724_v5  ;;  %4404 = vmatprep.subr.bf16.mxu0 %v4674_v30 }
 0x298   : > { %4392 = vmatmul.mubr.msk.f32.gmra.mxu0 %vm1146_vm2, %v4732_v20 }
 0x29a   : > { %4405 = vmatpush3.bf16.msra.mxu0 %v4674_v30 }
 0x29b   : > { %v4736_v25 = vpop.eup %4735 }
 0x29c   : > { %v4738_v26 = vpop.eup %4737  ;;  %4396 = vmatprep.mubr.msk.f32.mxu1 %vm1146_vm2, %v4736_v25 }
 0x29d   : > { %4397 = vmatmul.mubr.msk.f32.vlgmr.msra.gmra.mxu1 %vm1146_vm2, %v4738_v26 }
 0x2a2   : > { %v4740_v27 = vpop.eup %4739 }
 0x2a3   : > { %v4742_v28 = vpop.eup %4741  ;;  %4399 = vmatprep.mubr.msk.f32.mxu1 %vm1146_vm2, %v4740_v27 }
 0x2a4   : > { %4400 = vmatmul.mubr.msk.f32.gmra.mxu1 %vm1146_vm2, %v4742_v28 }
 0x348   : > { %v4366_v31 = vpop.f32.mrf.mxu1 }
 0x349   : > { %v4374_v32 = vpop.f32.mrf.mxu0  ;;  %v1252_v41 = vmul.f32 %v4366_v31, %v1249_v35 }
 0x34a   : > { %v1229_v33 = vpop.f32.mrf.mxu1  ;;  %v1376_v42 = vmul.f32 %v4374_v32, %v1373_v39 }
 0x34b   : > { %v1353_v34 = vpop.f32.mrf.mxu0  ;;  %v1251_v43 = vmul.f32 %v1249_v35, %v1229_v33 }
 0x34c   : > { %v1375_v44 = vmul.f32 %v1373_v39, %v1353_v34  ;;  %v1380_v52 = vadd.f32 %v1376_v42, %v1252_v41 }
 0x34e   : > { %v1379_v53 = vadd.f32 %v1375_v44, %v1251_v43 }
 0x34f   : > { %v4369_v36 = vpop.f32.mrf.mxu1 }
 0x350   : > { %v4377_v37 = vpop.f32.mrf.mxu0  ;;  %v1254_v58 = vmul.f32 %v4369_v36, %v1249_v35 }
 0x351   : > { %v1239_v38 = vpop.f32.mrf.mxu1  ;;  %v1378_v59 = vmul.f32 %v4377_v37, %v1373_v39 }
 0x352   : > { %v1363_v40 = vpop.f32.mrf.mxu0  ;;  %v1253_v61 = vmul.f32 %v1249_v35, %v1239_v38  ;;  %v1755_v35 = vpop.permute.xlu0 %1754 }
 0x353   : > { %v4382_v46 = vpop.f32.mrf.mxu1  ;;  %v1377_v62 = vmul.f32 %v1373_v39, %v1363_v40  ;;  %v1382_v17 = vadd.f32 %v1378_v59, %v1254_v58 }
 0x354   : > { %v4390_v48 = vpop.f32.mrf.mxu0  ;;  %v1500_v49 = vmul.f32 %v4382_v46, %v1497_v47 }
 0x355   : > { %v1477_v51 = vpop.f32.mrf.mxu1  ;;  %v1624_v63 = vmul.f32 %v4390_v48, %v1621_v57  ;;  %v1381_v18 = vadd.f32 %v1377_v62, %v1253_v61 }
 0x356   : > { %v1499_v16 = vmul.f32 %v1497_v47, %v1477_v51  ;;  %v1601_v50 = vpop.f32.mrf.mxu0  ;;  %v1504_v56 = vadd.f32 %v1500_v49, %v1380_v52 }
 0x357   : > { %v4385_v54 = vpop.f32.mrf.mxu1  ;;  %v1623_v0 = vmul.f32 %v1621_v57, %v1601_v50 }
 0x358   : > { %v1503_v55 = vadd.f32 %v1499_v16, %v1379_v53  ;;  %v4393_v1 = vpop.f32.mrf.mxu0  ;;  %v1502_v3 = vmul.f32 %v4385_v54, %v1497_v47  ;;  %v1628_v5 = vadd.f32 %v1624_v63, %v1504_v56 }
 0x359   : > { %v1487_v60 = vpop.f32.mrf.mxu1  ;;  %v1626_v25 = vmul.f32 %v4393_v1, %v1621_v57 }
 0x35a   : > { %v1501_v4 = vmul.f32 %v1497_v47, %v1487_v60  ;;  %v1627_v9 = vadd.f32 %v1623_v0, %v1503_v55  ;;  %v1611_v21 = vpop.f32.mrf.mxu0  ;;  %v1506_v22 = vadd.f32 %v1502_v3, %v1382_v17  ;;  %v5372_v3 = vld [vmem:[#allocation3 + $0x1] ss:$0 sm:$0xff]  ;;  %v4678_v17 = vld [vmem:[%s5735_s4 + $0x30] sm:$0xff]  }
 0x35b   : > { %v1625_v26 = vmul.f32 %v1621_v57, %v1611_v21 }
 0x35c   : > { %v1505_v23 = vadd.f32 %v1501_v4, %v1381_v18  ;;  %v1630_v28 = vadd.f32 %v1626_v25, %v1506_v22  ;;  %v4675_v4 = vld [vmem:[%s5734_s3 + $0x8] sm:$0xff]   ;;  %v4680_v25 = vld [vmem:[%s5735_s4 + $0x20] sm:$0xff]  }
 0x35d   : > { %v4398_v2 = vpop.f32.mrf.mxu1  ;;  %4410 = vmatprep.subr.bf16.mxu1 %v4675_v4  ;;  %v4679_v22 = vld [vmem:[%s5735_s4 + $0x28] sm:$0xff]  }
 0x35e   : > { %v1733_v19 = vmul.f32 %v4398_v2, %v1628_v5  ;;  %v1629_v29 = vadd.f32 %v1625_v26, %v1505_v23  ;;  %4411 = vmatpush3.bf16.msra.mxu1 %v4675_v4  ;;  %v4676_v5 = vld [vmem:[%s5734_s3] sm:$0xff]   ;;  %v4681_v26 = vld [vmem:[%s5735_s4 + $0x18] sm:$0xff]  }
 0x35f   : > { %v1713_v11 = vpop.f32.mrf.mxu1  ;;  %4412 = vmatprep.subr.bf16.mxu1 %v4676_v5 }
 0x360   : > { %v1732_v20 = vmul.f32 %v1713_v11, %v1627_v9  ;;  %v1895_v9 = vlaneseq  ;;  %v4677_v11 = vld [vmem:[%s5735_s4 + $0x38] sm:$0xff]  }
 0x361   : > { %4418 = vmatprep.subr.bf16.mxu0 %v4677_v11 }
 0x362   : > { %v1736_v24 = vpack.c.bf16 %v1733_v19, %v1732_v20  ;;  %4413 = vmatpush3.bf16.msra.mxu1 %v4676_v5  ;;  %v5388_v18 = vshrl.u32 %v1895_v9, 7  ;;  %v1893_v19 = vld [vmem:[#allocation3 + $0x1] sm:$0x3] }
 0x364   : > { %4406 = vmatprep.mubr.msk.bf16.mxu0 %vm642_vm0, %v1736_v24  ;;  %v4401_v27 = vpop.f32.mrf.mxu1  ;;  %v1897_v20 = vsub.s32 0, %v5388_v18  ;;  %v1901_v21 = vsub.s32 1, %v5388_v18  ;;  %v4695_v18 = vld [vmem:[%s5740_s9 + $0x18] sm:$0xff]  }
 0x365   : > { %v1735_v31 = vmul.f32 %v4401_v27, %v1630_v28 }
 0x366   : > { %v1723_v30 = vpop.f32.mrf.mxu1  ;;  %v1898_v23 = vrot.slane %v1893_v19, %v1897_v20  ;;  %v1902_v24 = vrot.slane %v1893_v19, %v1901_v21 }
 0x367   : > { %v1734_v32 = vmul.f32 %v1723_v30, %v1629_v29 }
 0x369   : > { %v1737_v33 = vpack.c.bf16 %v1735_v31, %v1734_v32 }
 0x36b   : > { %4407 = vmatmul.mubr.msk.bf16.vlgmr.msra.gmra.mxu0 %vm642_vm0, %v1737_v33 }
 0x36c   : > { %4419 = vmatpush3.bf16.msra.mxu0 %v4677_v11 }
 0x36d   : > { %4420 = vmatprep.subr.bf16.mxu0 %v4678_v17 }
 0x370   : > { %4421 = vmatpush3.bf16.msra.mxu0 %v4678_v17 }
 0x371   : > { %4422 = vmatprep.subr.bf16.mxu0 %v4679_v22 }
 0x374   : > { %4423 = vmatpush3.bf16.msra.mxu0 %v4679_v22 }
 0x375   : > { %4424 = vmatprep.subr.bf16.mxu0 %v4680_v25 }
 0x378   : > { %4425 = vmatpush3.bf16.msra.mxu0 %v4680_v25 }
 0x379   : > { %4426 = vmatprep.subr.bf16.mxu0 %v4681_v26 }
 0x37c   : > { %4427 = vmatpush3.bf16.msra.mxu0 %v4681_v26 }
 0x42b   : > { %v4408_v34 = vpop.f32.mrf.mxu0 }
 0x42c   : > { %v1806_v42 = vadd.f32 %v4408_v34, %v1755_v35 }
 0x42d   : > { %v1797_v36 = vpop.f32.mrf.mxu0 }
 0x42e   : > { %v1798_v37 = vadd.f32 %v1797_v36, %v1755_v35  ;;  %v1814_v51 = vadd.f32 %v1806_v42, %v5197_v8 }
 0x42f   : > { %v4409_v38 = vpop.f32.mrf.mxu0 }
 0x430   : > { %v1809_v39 = vadd.f32 %v4409_v38, %v1755_v35  ;;  %v1812_v40 = vadd.f32 %v1798_v37, %v5193_v6  ;;  %v1823_v6 = vsel %vm642_vm0, %v1814_v51, 0.0 }
 0x431   : > { %v1800_v41 = vpop.f32.mrf.mxu0 }
 0x432   : > { %v1801_v43 = vadd.f32 %v1800_v41, %v1755_v35  ;;  %v1817_v44 = vsel %vm642_vm0, %v1812_v40, 0.0  ;;  %v1815_v46 = vadd.f32 %v1809_v39, %v5201_v10 }
 0x433   : > { %1818 = vadd.xlane.f32.xlu1 %v1817_v44 }
 0x434   : > { %v1813_v47 = vadd.f32 %v1801_v43, %v5195_v7  ;;  %v1826_v49 = vsel %vm642_vm0, %v1815_v46, 0.0 }
 0x436   : > { %v1820_v48 = vsel %vm642_vm0, %v1813_v47, 0.0 }
 0x437   : > { %1821 = vadd.xlane.f32.xlu0 %v1820_v48  ;;  %1827 = vadd.xlane.f32.xlu1 %v1826_v49 }
 0x43b   : > { %1824 = vadd.xlane.f32.xlu0 %v1823_v6 }
 0x4bc   : > { %v1819_v16 = vpop.xlane.xlu1 %1818 }
 0x4bd   : > { %v1830_v52 = vmul.f32 0.03125, %v1819_v16 }
 0x4bf   : > { %v5352_v53 = vsub.f32 %v1812_v40, %v1830_v52 }
 0x4c0   : > { %v1822_v54 = vpop.xlane.xlu0 %1821  ;;  %v1828_v10 = vpop.xlane.xlu1 %1827 }
 0x4c1   : > { %v1831_v50 = vmul.f32 0.03125, %v1822_v54  ;;  %v1833_v56 = vmul.f32 0.03125, %v1828_v10  ;;  %v1838_v7 = vmul.f32 %v5352_v53, %v5352_v53 }
 0x4c3   : > { %v5356_v55 = vsub.f32 %v1813_v47, %v1831_v50  ;;  %v5358_v57 = vsub.f32 %v1815_v46, %v1833_v56  ;;  %v1842_v8 = vsel %vm642_vm0, %v1838_v7, 0.0  ;;  %v4682_v7 = vld [vmem:[%s5735_s4 + $0x10] sm:$0xff]  }
 0x4c4   : > { %v1825_v58 = vpop.xlane.xlu0 %1824  ;;  %1843 = vadd.xlane.f32.xlu0 %v1842_v8  ;;  %4428 = vmatprep.subr.bf16.mxu0 %v4682_v7  ;;  %v5430_v8 = vld [vmem:[#allocation3 + $0x2] ss:$0 sm:$0xff] }
 0x4c5   : > { %v1832_v59 = vmul.f32 0.03125, %v1825_v58  ;;  %v1839_v60 = vmul.f32 %v5356_v55, %v5356_v55  ;;  %v1841_v63 = vmul.f32 %v5358_v57, %v5358_v57  ;;  %4429 = vmatpush3.bf16.msra.mxu0 %v4682_v7 }
 0x4c7   : > { %v5363_v61 = vsub.f32 %v1814_v51, %v1832_v59  ;;  %v1845_v62 = vsel %vm642_vm0, %v1839_v60, 0.0  ;;  %v1851_v2 = vsel %vm642_vm0, %v1841_v63, 0.0 }
 0x4c8   : > { %1846 = vadd.xlane.f32.xlu1 %v1845_v62 }
 0x4c9   : > { %v1840_v0 = vmul.f32 %v5363_v61, %v5363_v61 }
 0x4cb   : > { %v1848_v1 = vsel %vm642_vm0, %v1840_v0, 0.0 }
 0x4cc   : > { %1849 = vadd.xlane.f32.xlu0 %v1848_v1  ;;  %1852 = vadd.xlane.f32.xlu1 %v1851_v2 }
 0x4dd   : > { %1915 = vrot.lane.b32.xlu1 %v1898_v23, %s4974_s17 }
 0x4e1   : > { %1917 = vrot.lane.b32.xlu1 %v1902_v24, %s4974_s17 }
 0x4e2   : > { %1880 = vrot.lane.b32.xlu0 %v5372_v3, %s4973_s10 }
 0x4e6   : > { %2053 = vrot.lane.b32.xlu0 %v5430_v8, %s4974_s17 }
 0x54d   : > { %v1844_v27 = vpop.xlane.xlu0 %1843 }
 0x54e   : > { %v1854_v28 = vmul.f32 0.03125, %v1844_v27 }
 0x550   : > { %v1858_v29 = vadd.f32 1e-05, %v1854_v28 }
 0x551   : > { %v1847_v30 = vpop.xlane.xlu1 %1846 }
 0x552   : > { %4743 = vrsqrt.f32 %v1858_v29  ;;  %v1855_v31 = vmul.f32 0.03125, %v1847_v30 }
 0x554   : > { %v1859_v32 = vadd.f32 1e-05, %v1855_v31 }
 0x555   : > { %v1850_v33 = vpop.xlane.xlu0 %1849  ;;  %v1853_v34 = vpop.xlane.xlu1 %1852 }
 0x556   : > { %4745 = vrsqrt.f32 %v1859_v32  ;;  %v1856_v35 = vmul.f32 0.03125, %v1850_v33  ;;  %v1857_v36 = vmul.f32 0.03125, %v1853_v34 }
 0x558   : > { %v1860_v37 = vadd.f32 1e-05, %v1856_v35  ;;  %v1861_v38 = vadd.f32 1e-05, %v1857_v36 }
 0x559   : > { %v1881_v44 = vpop.permute.xlu0 %1880  ;;  %v1916_v58 = vpop.permute.xlu1 %1915 }
 0x55a   : > { %4747 = vrsqrt.f32 %v1860_v37 }
 0x55b   : > { %4749 = vrsqrt.f32 %v1861_v38 }
 0x55d   : > { %v1918_v59 = vpop.permute.xlu1 %1917  ;;  %v2054_v24 = vpop.permute.xlu0 %2053 }
 0x55e   : > { %v1920_v62 = vsel %vm1919_vm3, %v1916_v58, %v1918_v59 }
 0x55f   : > { %v4744_v39 = vpop.eup %4743 }
 0x560   : > { %v1866_v40 = vmul.f32 %v4744_v39, %v5352_v53 }
 0x562   : > { %v1876_v42 = vmul.f32 %v5372_v3, %v1866_v40 }
 0x563   : > { %v4746_v41 = vpop.eup %4745 }
 0x564   : > { %v1867_v43 = vmul.f32 %v4746_v41, %v5356_v55  ;;  %v1883_v51 = vadd.f32 %v1881_v44, %v1876_v42  ;;  %v4683_v55 = vld [vmem:[%s5735_s4 + $0x8] sm:$0xff]  }
 0x565   : > { %4430 = vmatprep.subr.bf16.mxu0 %v4683_v55 }
 0x566   : > { %v1877_v46 = vmul.f32 %v5372_v3, %v1867_v43  ;;  %4431 = vmatpush3.bf16.msra.mxu0 %v4683_v55 }
 0x567   : > { %v4748_v47 = vpop.eup %4747 }
 0x568   : > { %v4750_v48 = vpop.eup %4749  ;;  %v1868_v49 = vmul.f32 %v4748_v47, %v5363_v61  ;;  %v5412_v6 = vadd.f32 %v1881_v44, %v1877_v46 }
 0x569   : > { %v1869_v16 = vmul.f32 %v4750_v48, %v5358_v57  ;;  %v4684_v57 = vld [vmem:[%s5735_s4] sm:$0xff]  }
 0x56a   : > { %v1878_v52 = vmul.f32 %v5372_v3, %v1868_v49  ;;  %v1887_v53 = vpack.c.bf16 %v5412_v6, %v1883_v51  ;;  %4432 = vmatprep.subr.bf16.mxu0 %v4684_v57 }
 0x56b   : > { %v1879_v54 = vmul.f32 %v5372_v3, %v1869_v16  ;;  %4433 = vmatpush3.bf16.msra.mxu0 %v4684_v57 }
 0x56c   : > { %v1885_v10 = vadd.f32 %v1881_v44, %v1878_v52  ;;  %4414 = vmatprep.mubr.msk.bf16.mxu1 %vm642_vm0, %v1887_v53  ;;  %4488 = vmatprep.subr.mxu0 %v5210_v12 }
 0x56d   : > { %v1886_v50 = vadd.f32 %v1881_v44, %v1879_v54 }
 0x56f   : > { %v1888_v56 = vpack.c.bf16 %v1886_v50, %v1885_v10 }
 0x571   : > { %4415 = vmatmul.mubr.msk.bf16.vlgmr.msra.gmra.mxu1 %vm642_vm0, %v1888_v56  ;;  %v4686_v56 = vld [vmem:[%s5737_s6] sm:$0xff]  }
 0x631   : > { %v4416_v60 = vpop.f32.mrf.mxu1 }
 0x632   : > { %v1971_v2 = vadd.f32 %v4416_v60, %v1920_v62 }
 0x633   : > { %v1962_v61 = vpop.f32.mrf.mxu1 }
 0x634   : > { %v1963_v0 = vadd.f32 %v1962_v61, %v1920_v62  ;;  %v1979_v17 = vmax.f32 %v1971_v2, 0.0 }
 0x635   : > { %v4417_v63 = vpop.f32.mrf.mxu1 }
 0x636   : > { %v1974_v1 = vadd.f32 %v4417_v63, %v1920_v62  ;;  %v1977_v9 = vmax.f32 %v1963_v0, 0.0 }
 0x637   : > { %v1965_v3 = vpop.f32.mrf.mxu1 }
 0x638   : > { %v1966_v4 = vadd.f32 %v1965_v3, %v1920_v62  ;;  %v1980_v5 = vmax.f32 %v1974_v1, 0.0 }
 0x63a   : > { %v1978_v11 = vmax.f32 %v1966_v4, 0.0  ;;  %v1982_v22 = vpack.c.bf16 %v1980_v5, %v1979_v17 }
 0x63c   : > { %v1981_v19 = vpack.c.bf16 %v1978_v11, %v1977_v9  ;;  %v4057_v11 = vld [vmem:[#allocation3 + $0x3] ss:$0 sm:$0xff] }
 0x63e   : > { %4434 = vmatprep.mubr.bf16.mxu0 %v1981_v19 }
 0x63f   : > { %4435 = vmatmul.mubr.bf16.vlgmr.msra.gmra.mxu0 %v1982_v22 }
 0x640   : > { %4489 = vmatpush3.msra.mxu0 %v5210_v12 }
 0x641   : > { %4490 = vmatprep.subr.mxu0 %v5219_v13 }
 0x642   : > { %4491 = vmatpush3.msra.mxu0 %v5219_v13 }
 0x643   : > { %4492 = vmatprep.subr.mxu0 %v5227_v14 }
 0x644   : > { %4493 = vmatpush3.msra.mxu0 %v5227_v14 }
 0x645   : > { %4494 = vmatprep.subr.mxu0 %v5236_v15 }
 0x646   : > { %4495 = vmatpush3.msra.mxu0 %v5236_v15 }
 0x647   : > { %4510 = vmatprep.subr.msk.mxu0 %vm1159_vm1, %v5292_v45 }
 0x6ff   : > { %v4436_v23 = vpop.f32.mrf.mxu0 }
 0x700   : > { %v2099_v13 = vadd.f32 %v4436_v23, %v2054_v24 }
 0x701   : > { %v2090_v25 = vpop.f32.mrf.mxu0 }
 0x702   : > { %v2091_v26 = vadd.f32 %v2090_v25, %v2054_v24  ;;  %v2107_v34 = vadd.f32 %v2099_v13, %v1885_v10 }
 0x703   : > { %v4437_v27 = vpop.f32.mrf.mxu0 }
 0x704   : > { %v2102_v28 = vadd.f32 %v4437_v27, %v2054_v24  ;;  %v2105_v29 = vadd.f32 %v2091_v26, %v1883_v51  ;;  %v2116_v35 = vsel %vm642_vm0, %v2107_v34, 0.0 }
 0x705   : > { %v2093_v30 = vpop.f32.mrf.mxu0 }
 0x706   : > { %v2094_v31 = vadd.f32 %v2093_v30, %v2054_v24  ;;  %v2110_v32 = vsel %vm642_vm0, %v2105_v29, 0.0  ;;  %v2108_v14 = vadd.f32 %v2102_v28, %v1886_v50  ;;  %v4685_v50 = vld [vmem:[%s5737_s6 + $0x8] sm:$0xff]  }
 0x707   : > { %2111 = vadd.xlane.f32.xlu1 %v2110_v32  ;;  %4438 = vmatprep.subr.bf16.mxu1 %v4685_v50  ;;  %v4815_v32 = vld [vmem:[%s5745_s14 + $0x18] sm:$0xff] }
 0x708   : > { %v2106_v33 = vadd.f32 %v2094_v31, %v5412_v6  ;;  %v2119_v45 = vsel %vm642_vm0, %v2108_v14, 0.0  ;;  %4439 = vmatpush3.bf16.msra.mxu1 %v4685_v50 }
 0x709   : > { %4440 = vmatprep.subr.bf16.mxu1 %v4686_v56 }
 0x70a   : > { %v2113_v15 = vsel %vm642_vm0, %v2106_v33, 0.0 }
 0x70b   : > { %2114 = vadd.xlane.f32.xlu0 %v2113_v15  ;;  %2120 = vadd.xlane.f32.xlu1 %v2119_v45  ;;  %v5496_v15 = vld [vmem:[%s5745_s14] sm:$0xff] }
 0x70c   : > { %4441 = vmatpush3.bf16.msra.mxu1 %v4686_v56  ;;  %v4058_v45 = vld [vmem:[#allocation6] ss:$0 sm:$0xff] }
 0x70d   : > { %4446 = vmatprep.subr.mxu1 %v5210_v12 }
 0x70f   : > { %2117 = vadd.xlane.f32.xlu0 %v2116_v35 }
 0x790   : > { %v2112_v36 = vpop.xlane.xlu1 %2111 }
 0x791   : > { %v2122_v37 = vmul.f32 0.03125, %v2112_v36 }
 0x793   : > { %v2126_v38 = vsub.f32 %v2105_v29, %v2122_v37 }
 0x794   : > { %v2115_v39 = vpop.xlane.xlu0 %2114  ;;  %v2121_v40 = vpop.xlane.xlu1 %2120 }
 0x795   : > { %v2123_v41 = vmul.f32 0.03125, %v2115_v39  ;;  %v2125_v42 = vmul.f32 0.03125, %v2121_v40  ;;  %v2130_v43 = vmul.f32 %v2126_v38, %v2126_v38 }
 0x797   : > { %v2127_v44 = vsub.f32 %v2106_v33, %v2123_v41  ;;  %v2129_v46 = vsub.f32 %v2108_v14, %v2125_v42  ;;  %v2134_v47 = vsel %vm642_vm0, %v2130_v43, 0.0  ;;  %v5482_v14 = vld [vmem:[%s5745_s14 + $0x10] sm:$0xff]  ;;  %v5489_v33 = vld [vmem:[%s5745_s14 + $0x8] sm:$0xff] }
 0x798   : > { %v2118_v48 = vpop.xlane.xlu0 %2117  ;;  %2135 = vadd.xlane.f32.xlu0 %v2134_v47 }
 0x799   : > { %v2124_v49 = vmul.f32 0.03125, %v2118_v48  ;;  %v2131_v51 = vmul.f32 %v2127_v44, %v2127_v44  ;;  %v2133_v52 = vmul.f32 %v2129_v46, %v2129_v46 }
 0x79b   : > { %v2128_v6 = vsub.f32 %v2107_v34, %v2124_v49  ;;  %v2137_v16 = vsel %vm642_vm0, %v2131_v51, 0.0  ;;  %v2143_v10 = vsel %vm642_vm0, %v2133_v52, 0.0 }
 0x79c   : > { %2138 = vadd.xlane.f32.xlu1 %v2137_v16 }
 0x79d   : > { %v2132_v53 = vmul.f32 %v2128_v6, %v2128_v6 }
 0x79f   : > { %v2140_v54 = vsel %vm642_vm0, %v2132_v53, 0.0 }
 0x7a0   : > { %2141 = vadd.xlane.f32.xlu0 %v2140_v54  ;;  %2144 = vadd.xlane.f32.xlu1 %v2143_v10 }
 0x7b6   : > { %2162 = vrot.lane.b32.xlu0 %v5430_v8, %s4975_s20 }
 0x821   : > { %v2136_v7 = vpop.xlane.xlu0 %2135 }
 0x822   : > { %v2146_v55 = vmul.f32 0.03125, %v2136_v7 }
 0x824   : > { %v2150_v57 = vadd.f32 1e-05, %v2146_v55 }
 0x825   : > { %v2139_v58 = vpop.xlane.xlu1 %2138 }
 0x826   : > { %4751 = vrsqrt.f32 %v2150_v57  ;;  %v2147_v8 = vmul.f32 0.03125, %v2139_v58  ;;  %v5537_v58 = vld [vmem:[%s5746_s15] sm:$0xf] }
 0x828   : > { %v2151_v59 = vadd.f32 1e-05, %v2147_v8 }
 0x829   : > { %v2142_v60 = vpop.xlane.xlu0 %2141  ;;  %v2145_v61 = vpop.xlane.xlu1 %2144 }
 0x82a   : > { %4753 = vrsqrt.f32 %v2151_v59  ;;  %v2148_v62 = vmul.f32 0.03125, %v2142_v60  ;;  %v2149_v63 = vmul.f32 0.03125, %v2145_v61 }
 0x82c   : > { %v2152_v0 = vadd.f32 1e-05, %v2148_v62  ;;  %v2153_v1 = vadd.f32 1e-05, %v2149_v63 }
 0x82d   : > { %v2163_v4 = vpop.permute.xlu0 %2162 }
 0x82e   : > { %4755 = vrsqrt.f32 %v2152_v0 }
 0x82f   : > { %4757 = vrsqrt.f32 %v2153_v1 }
 0x833   : > { %v4752_v2 = vpop.eup %4751 }
 0x834   : > { %v2158_v3 = vmul.f32 %v4752_v2, %v2126_v38 }
 0x836   : > { %v2165_v9 = vmul.f32 %v2163_v4, %v2158_v3 }
 0x837   : > { %v4754_v12 = vpop.eup %4753 }
 0x838   : > { %v2159_v5 = vmul.f32 %v4754_v12, %v2127_v44  ;;  %v5462_v24 = vadd.f32 %v4057_v11, %v2165_v9 }
 0x83a   : > { %v2166_v17 = vmul.f32 %v2163_v4, %v2159_v5 }
 0x83b   : > { %v4756_v19 = vpop.eup %4755 }
 0x83c   : > { %v4758_v22 = vpop.eup %4757  ;;  %v2160_v23 = vmul.f32 %v4756_v19, %v2128_v6  ;;  %v5464_v25 = vadd.f32 %v4057_v11, %v2166_v17 }
 0x83d   : > { %v2161_v26 = vmul.f32 %v4758_v22, %v2129_v46 }
 0x83e   : > { %v2167_v27 = vmul.f32 %v2163_v4, %v2160_v23  ;;  %v2179_v28 = vpack.c.bf16 %v5464_v25, %v5462_v24 }
 0x83f   : > { %v2168_v29 = vmul.f32 %v2163_v4, %v2161_v26 }
 0x840   : > { %v5468_v30 = vadd.f32 %v4057_v11, %v2167_v27  ;;  %4442 = vmatprep.mubr.msk.bf16.mxu1 %vm642_vm0, %v2179_v28 }
 0x841   : > { %v5471_v13 = vadd.f32 %v4057_v11, %v2168_v29 }
 0x843   : > { %v2180_v31 = vpack.c.bf16 %v5471_v13, %v5468_v30 }
 0x845   : > { %4443 = vmatmul.mubr.msk.bf16.vlgmr.msra.gmra.mxu1 %vm642_vm0, %v2180_v31 }
 0x846   : > { %4447 = vmatpush3.msra.mxu1 %v4815_v32 }
 0x847   : > { %4448 = vmatprep.subr.mxu1 %v5482_v14 }
 0x848   : > { %4449 = vmatpush3.msra.mxu1 %v5482_v14 }
 0x849   : > { %4450 = vmatprep.subr.mxu1 %v5489_v33 }
 0x84a   : > { %4451 = vmatpush3.msra.mxu1 %v5489_v33 }
 0x84b   : > { %4452 = vmatprep.subr.mxu1 %v5496_v15 }
 0x84c   : > { %4453 = vmatpush3.msra.mxu1 %v5496_v15 }
 0x84d   : > { %4460 = vmatprep.subr.mxu1 %v4815_v32 }
 0x905   : > { %v4444_v34 = vpop.f32.mrf.mxu1 }
 0x906   : > { %v2253_v35 = vadd.f32 %v4444_v34, %v4058_v45 }
 0x907   : > { %v2244_v36 = vpop.f32.mrf.mxu1 }
 0x908   : > { %v2245_v37 = vadd.f32 %v4058_v45, %v2244_v36  ;;  %2470 = vrot.lane.b32.xlu0 %v2253_v35, %s4973_s10 }
 0x909   : > { %v4445_v38 = vpop.f32.mrf.mxu1 }
 0x90a   : > { %2260 = vrot.lane.b32.xlu1 %v2245_v37, %s4973_s10  ;;  %v2256_v41 = vadd.f32 %v4445_v38, %v4058_v45 }
 0x90b   : > { %v2247_v39 = vpop.f32.mrf.mxu1 }
 0x90c   : > { %v2248_v40 = vadd.f32 %v4058_v45, %v2247_v39  ;;  %2804 = vrot.lane.b32.xlu0 %v2245_v37, %s4974_s17 }
 0x90e   : > { %2365 = vrot.lane.b32.xlu1 %v2248_v40, %s4973_s10 }
 0x910   : > { %3052 = vrot.lane.b32.xlu0 %v2253_v35, %s4974_s17 }
 0x912   : > { %2575 = vrot.lane.b32.xlu1 %v2256_v41, %s4973_s10 }
 0x914   : > { %3310 = vrot.lane.b32.xlu0 %v4058_v45, %s4975_s20 }
 0x916   : > { %2928 = vrot.lane.b32.xlu1 %v2248_v40, %s4974_s17 }
 0x91a   : > { %3176 = vrot.lane.b32.xlu1 %v2256_v41, %s4974_s17 }
 0x97a   : > { %v2471_v54 = vpop.permute.xlu0 %2470 }
 0x97b   : > { %v2473_v7 = vmul.f32 %v2471_v54, %v2245_v37  ;;  %v2474_v55 = vmul.f32 %v2471_v54, %v2248_v40  ;;  %v2475_v57 = vmul.f32 %v2471_v54, %v2253_v35  ;;  %v2476_v8 = vmul.f32 %v2471_v54, %v2256_v41 }
 0x97c   : > { %v2261_v42 = vpop.permute.xlu1 %2260 }
 0x97d   : > { %v2263_v43 = vmul.f32 %v2261_v42, %v2245_v37  ;;  %v2264_v44 = vmul.f32 %v2261_v42, %v2248_v40  ;;  %v2265_v46 = vmul.f32 %v2261_v42, %v2253_v35  ;;  %v2266_v48 = vmul.f32 %v2261_v42, %v2256_v41 }
 0x97f   : > { %4454 = vmatprep.mubr.msk.f32.mxu1 %vm642_vm0, %v2263_v43 }
 0x980   : > { %4455 = vmatmul.mubr.msk.f32.vlgmr.msra.gmra.mxu1 %vm642_vm0, %v2264_v44  ;;  %v2366_v47 = vpop.permute.xlu1 %2365 }
 0x981   : > { %4461 = vmatpush3.msra.mxu1 %v4815_v32  ;;  %4457 = vmatprep.mubr.msk.f32.mxu1 %vm642_vm0, %v2265_v46  ;;  %v2368_v49 = vmul.f32 %v2366_v47, %v2245_v37  ;;  %v2369_v52 = vmul.f32 %v2366_v47, %v2248_v40  ;;  %v2370_v53 = vmul.f32 %v2366_v47, %v2253_v35 }
 0x982   : > { %4462 = vmatprep.subr.mxu1 %v5482_v14  ;;  %v2371_v50 = vmul.f32 %v2366_v47, %v2256_v41 }
 0x983   : > { %4463 = vmatpush3.msra.mxu1 %v5482_v14 }
 0x984   : > { %4464 = vmatprep.subr.mxu1 %v5489_v33  ;;  %4458 = vmatmul.mubr.msk.f32.gmra.mxu1 %vm642_vm0, %v2266_v48  ;;  %v2576_v51 = vpop.permute.xlu1 %2575 }
 0x985   : > { %4465 = vmatpush3.msra.mxu1 %v5489_v33  ;;  %v2578_v6 = vmul.f32 %v2576_v51, %v2245_v37  ;;  %v2579_v16 = vmul.f32 %v2576_v51, %v2248_v40  ;;  %4468 = vmatprep.mubr.msk.f32.mxu1 %vm642_vm0, %v2368_v49  ;;  %v2580_v10 = vmul.f32 %v2576_v51, %v2253_v35 }
 0x986   : > { %4466 = vmatprep.subr.mxu1 %v5496_v15  ;;  %v2581_v56 = vmul.f32 %v2576_v51, %v2256_v41 }
 0x987   : > { %4467 = vmatpush3.msra.mxu1 %v5496_v15  ;;  %4496 = vmatprep.mubr.msk.f32.mxu0 %vm642_vm0, %v2578_v6 }
 0x988   : > { %4474 = vmatprep.subr.mxu1 %v4815_v32  ;;  %4469 = vmatmul.mubr.msk.f32.vlgmr.msra.gmra.mxu1 %vm642_vm0, %v2369_v52 }
 0x989   : > { %4475 = vmatpush3.msra.mxu1 %v4815_v32  ;;  %4497 = vmatmul.mubr.msk.f32.vlgmr.msra.gmra.mxu0 %vm642_vm0, %v2579_v16 }
 0x98a   : > { %4471 = vmatprep.mubr.msk.f32.mxu1 %vm642_vm0, %v2370_v53  ;;  %4476 = vmatprep.subr.mxu1 %v5482_v14 }
 0x98b   : > { %4499 = vmatprep.mubr.msk.f32.mxu0 %vm642_vm0, %v2580_v10  ;;  %4477 = vmatpush3.msra.mxu1 %v5482_v14 }
 0x98c   : > { %4478 = vmatprep.subr.mxu1 %v5489_v33  ;;  %4472 = vmatmul.mubr.msk.f32.gmra.mxu1 %vm642_vm0, %v2371_v50 }
 0x98d   : > { %4479 = vmatpush3.msra.mxu1 %v5489_v33  ;;  %4500 = vmatmul.mubr.msk.f32.gmra.mxu0 %vm642_vm0, %v2581_v56 }
 0x98e   : > { %4480 = vmatprep.subr.mxu1 %v5496_v15  ;;  %4482 = vmatprep.mubr.msk.f32.mxu1 %vm642_vm0, %v2473_v7 }
 0x98f   : > { %4481 = vmatpush3.msra.mxu1 %v5496_v15  ;;  %4511 = vmatpush3.msk.msra.mxu0 %vm1159_vm1, %v5537_v58 }
 0x990   : > { %4483 = vmatmul.mubr.msk.f32.vlgmr.msra.gmra.mxu1 %vm642_vm0, %v2474_v55  ;;  %4502 = vmatprep.subr.msk.mxu1 %vm1159_vm1, %v5537_v58 }
 0x991   : > { %4485 = vmatprep.mubr.msk.f32.mxu1 %vm642_vm0, %v2475_v57  ;;  %4503 = vmatpush3.msk.msra.mxu1 %vm1159_vm1, %v5537_v58 }
 0x992   : > { %4518 = vmatprep.subr.msk.mxu1 %vm1159_vm1, %v5537_v58  ;;  %4526 = vmatprep.subr.msk.mxu0 %vm1159_vm1, %v5537_v58 }
 0x994   : > { %4486 = vmatmul.mubr.msk.f32.gmra.mxu1 %vm642_vm0, %v2476_v8 }
 0xa40   : > { %v4456_v59 = vpop.f32.mrf.mxu1 }
 0xa42   : > { %v2345_v60 = vpop.f32.mrf.mxu1 }
 0xa44   : > { %v4459_v61 = vpop.f32.mrf.mxu1 }
 0xa46   : > { %v2355_v62 = vpop.f32.mrf.mxu1 }
 0xa48   : > { %v4470_v63 = vpop.f32.mrf.mxu1 }
 0xa49   : > { %v4498_v1 = vpop.f32.mrf.mxu0  ;;  %v2680_v4 = vmax.f32 %v4456_v59, %v4470_v63 }
 0xa4a   : > { %v2450_v0 = vpop.f32.mrf.mxu1 }
 0xa4b   : > { %v2660_v12 = vpop.f32.mrf.mxu0  ;;  %v2679_v9 = vmax.f32 %v2345_v60, %v2450_v0 }
 0xa4c   : > { %v4473_v2 = vpop.f32.mrf.mxu1 }
 0xa4d   : > { %v2682_v23 = vmax.f32 %v4459_v61, %v4473_v2  ;;  %v4501_v26 = vpop.f32.mrf.mxu0 }
 0xa4e   : > { %v2460_v3 = vpop.f32.mrf.mxu1 }
 0xa4f   : > { %v2681_v27 = vmax.f32 %v2355_v62, %v2460_v3  ;;  %v2670_v38 = vpop.f32.mrf.mxu0 }
 0xa50   : > { %v4484_v5 = vpop.f32.mrf.mxu1 }
 0xa51   : > { %v2684_v11 = vmax.f32 %v2680_v4, %v4484_v5 }
 0xa52   : > { %v2555_v17 = vpop.f32.mrf.mxu1 }
 0xa53   : > { %v2688_v19 = vmax.f32 %v2684_v11, %v4498_v1  ;;  %v2683_v22 = vmax.f32 %v2679_v9, %v2555_v17 }
 0xa54   : > { %v4487_v28 = vpop.f32.mrf.mxu1 }
 0xa55   : > { %v2692_v29 = vsub.f32 %v4456_v59, %v2688_v19  ;;  %v2816_v31 = vsub.f32 %v4470_v63, %v2688_v19  ;;  %v2940_v32 = vsub.f32 %v4484_v5, %v2688_v19  ;;  %v3064_v14 = vsub.f32 %v4498_v1, %v2688_v19 }
 0xa56   : > { %v2687_v33 = vmax.f32 %v2683_v22, %v2660_v12  ;;  %v2686_v15 = vmax.f32 %v2682_v23, %v4487_v28  ;;  %v2565_v45 = vpop.f32.mrf.mxu1 }
 0xa57   : > { %v2697_v34 = vmul.f32 1.442695, %v2692_v29  ;;  %v2821_v35 = vmul.f32 1.442695, %v2816_v31  ;;  %v2945_v36 = vmul.f32 1.442695, %v2940_v32  ;;  %v2685_v37 = vmax.f32 %v2681_v27, %v2565_v45 }
 0xa58   : > { %v3069_v39 = vmul.f32 1.442695, %v3064_v14  ;;  %v2691_v40 = vsub.f32 %v2345_v60, %v2687_v33  ;;  %v2815_v41 = vsub.f32 %v2450_v0, %v2687_v33  ;;  %v2939_v42 = vsub.f32 %v2555_v17, %v2687_v33 }
 0xa59   : > { %4759 = vpow2.f32 %v2697_v34  ;;  %v3063_v43 = vsub.f32 %v2660_v12, %v2687_v33  ;;  %v2690_v44 = vmax.f32 %v2686_v15, %v4501_v26  ;;  %v2689_v46 = vmax.f32 %v2685_v37, %v2670_v38 }
 0xa5a   : > { %4761 = vpow2.f32 %v2821_v35  ;;  %v2695_v47 = vmul.f32 1.442695, %v2691_v40  ;;  %v2819_v48 = vmul.f32 1.442695, %v2815_v41  ;;  %v2943_v49 = vmul.f32 1.442695, %v2939_v42 }
 0xa5b   : > { %4763 = vpow2.f32 %v2945_v36  ;;  %v2694_v51 = vsub.f32 %v4459_v61, %v2690_v44  ;;  %v2818_v6 = vsub.f32 %v4473_v2, %v2690_v44  ;;  %v3067_v16 = vmul.f32 1.442695, %v3063_v43  ;;  %v4688_v42 = vld [vmem:[%s5738_s7] sm:$0xff]  }
 0xa5c   : > { %4765 = vpow2.f32 %v3069_v39  ;;  %v2942_v52 = vsub.f32 %v4487_v28, %v2690_v44  ;;  %v2693_v54 = vsub.f32 %v2355_v62, %v2689_v46  ;;  %v2817_v50 = vsub.f32 %v2460_v3, %v2689_v46 }
 0xa5d   : > { %4767 = vpow2.f32 %v2695_v47  ;;  %v2701_v53 = vmul.f32 1.442695, %v2694_v51  ;;  %v2825_v10 = vmul.f32 1.442695, %v2818_v6  ;;  %v2941_v7 = vsub.f32 %v2565_v45, %v2689_v46 }
 0xa5e   : > { %4769 = vpow2.f32 %v2819_v48  ;;  %v2949_v56 = vmul.f32 1.442695, %v2942_v52  ;;  %v3066_v55 = vsub.f32 %v4501_v26, %v2690_v44  ;;  %v2699_v57 = vmul.f32 1.442695, %v2693_v54  ;;  %v2805_v48 = vpop.permute.xlu0 %2804 }
 0xa5f   : > { %4771 = vpow2.f32 %v2943_v49  ;;  %v2823_v8 = vmul.f32 1.442695, %v2817_v50  ;;  %v3065_v59 = vsub.f32 %v2670_v38, %v2689_v46  ;;  %v2947_v60 = vmul.f32 1.442695, %v2941_v7 }
 0xa60   : > { %4773 = vpow2.f32 %v3067_v16  ;;  %v3073_v61 = vmul.f32 1.442695, %v3066_v55  ;;  %v2929_v16 = vpop.permute.xlu1 %2928 }
 0xa61   : > { %4775 = vpow2.f32 %v2701_v53  ;;  %v3071_v62 = vmul.f32 1.442695, %v3065_v59 }
 0xa62   : > { %4777 = vpow2.f32 %v2825_v10  ;;  %v3053_v7 = vpop.permute.xlu0 %3052 }
 0xa63   : > { %4779 = vpow2.f32 %v2949_v56 }
 0xa64   : > { %4781 = vpow2.f32 %v2699_v57 }
 0xa65   : > { %4783 = vpow2.f32 %v2823_v8 }
 0xa66   : > { %v4760_v63 = vpop.eup %4759  ;;  %4785 = vpow2.f32 %v2947_v60 }
 0xa67   : > { %v4762_v0 = vpop.eup %4761  ;;  %4787 = vpow2.f32 %v3073_v61 }
 0xa68   : > { %v4764_v1 = vpop.eup %4763  ;;  %v2828_v2 = vadd.f32 %v4762_v0, %v4760_v63  ;;  %4789 = vpow2.f32 %v3071_v62 }
 0xa69   : > { %v4766_v3 = vpop.eup %4765 }
 0xa6a   : > { %v4768_v4 = vpop.eup %4767  ;;  %v2952_v5 = vadd.f32 %v4764_v1, %v2828_v2  ;;  %v3177_v2 = vpop.permute.xlu1 %3176 }
 0xa6b   : > { %v4770_v12 = vpop.eup %4769  ;;  %4504 = vmatprep.mubr.msk.f32.mxu1 %vm1146_vm2, %v4768_v4 }
 0xa6c   : > { %v4772_v9 = vpop.eup %4771  ;;  %v2827_v11 = vadd.f32 %v4770_v12, %v4768_v4  ;;  %4512 = vmatprep.mubr.msk.f32.mxu0 %vm1146_vm2, %v4770_v12  ;;  %4505 = vmatmul.mubr.msk.f32.vlgmr.msra.gmra.mxu1 %vm1146_vm2, %v4760_v63  ;;  %v3076_v26 = vadd.f32 %v4766_v3, %v2952_v5 }
 0xa6d   : > { %v4774_v17 = vpop.eup %4773  ;;  %4513 = vmatmul.mubr.msk.f32.vlgmr.msra.gmra.mxu0 %vm1146_vm2, %v4762_v0  ;;  %4519 = vmatpush3.msk.msra.mxu1 %vm1159_vm1, %v5537_v58 }
 0xa6e   : > { %v4776_v19 = vpop.eup %4775  ;;  %v2951_v22 = vadd.f32 %v4772_v9, %v2827_v11  ;;  %4527 = vmatpush3.msk.msra.mxu0 %vm1159_vm1, %v5537_v58  ;;  %4534 = vmatprep.subr.msk.mxu1 %vm1159_vm1, %v5537_v58 }
 0xa6f   : > { %v4778_v23 = vpop.eup %4777 }
 0xa70   : > { %v3075_v27 = vadd.f32 %v4774_v17, %v2951_v22  ;;  %v2830_v28 = vadd.f32 %v4778_v23, %v4776_v19  ;;  %v4780_v29 = vpop.eup %4779 }
 0xa71   : > { %v4782_v31 = vpop.eup %4781 }
 0xa72   : > { %4791 = vrcp.f32 %v3075_v27  ;;  %v4784_v32 = vpop.eup %4783  ;;  %v2954_v14 = vadd.f32 %v4780_v29, %v2830_v28  ;;  %4507 = vmatprep.mubr.msk.f32.mxu1 %vm1146_vm2, %v4782_v31 }
 0xa73   : > { %4793 = vrcp.f32 %v3076_v26  ;;  %v2829_v33 = vadd.f32 %v4784_v32, %v4782_v31  ;;  %4515 = vmatprep.mubr.msk.f32.mxu0 %vm1146_vm2, %v4784_v32  ;;  %4508 = vmatmul.mubr.msk.f32.gmra.mxu1 %vm1146_vm2, %v4776_v19  ;;  %v4786_v15 = vpop.eup %4785 }
 0xa74   : > { %4516 = vmatmul.mubr.msk.f32.gmra.mxu0 %vm1146_vm2, %v4778_v23  ;;  %4520 = vmatprep.mubr.msk.f32.mxu1 %vm1146_vm2, %v4772_v9  ;;  %v4788_v45 = vpop.eup %4787 }
 0xa75   : > { %v2953_v34 = vadd.f32 %v4786_v15, %v2829_v33  ;;  %4528 = vmatprep.mubr.msk.f32.mxu0 %vm1146_vm2, %v4774_v17  ;;  %v4790_v35 = vpop.eup %4789  ;;  %v3078_v36 = vadd.f32 %v4788_v45, %v2954_v14 }
 0xa77   : > { %v3077_v37 = vadd.f32 %v4790_v35, %v2953_v34  ;;  %4521 = vmatmul.mubr.msk.f32.vlgmr.msra.gmra.mxu1 %vm1146_vm2, %v4764_v1 }
 0xa78   : > { %4529 = vmatmul.mubr.msk.f32.vlgmr.msra.gmra.mxu0 %vm1146_vm2, %v4766_v3  ;;  %4523 = vmatprep.mubr.msk.f32.mxu1 %vm1146_vm2, %v4786_v15 }
 0xa79   : > { %4795 = vrcp.f32 %v3077_v37  ;;  %4531 = vmatprep.mubr.msk.f32.mxu0 %vm1146_vm2, %v4790_v35  ;;  %4535 = vmatpush3.msk.msra.mxu1 %vm1159_vm1, %v5537_v58  ;;  %v4687_v58 = vld [vmem:[%s5738_s7 + $0x8] sm:$0xff]  }
 0xa7a   : > { %4797 = vrcp.f32 %v3078_v36  ;;  %4542 = vmatprep.subr.bf16.mxu0 %v4687_v58 }
 0xa7b   : > { %4524 = vmatmul.mubr.msk.f32.gmra.mxu1 %vm1146_vm2, %v4780_v29  ;;  %4543 = vmatpush3.bf16.msra.mxu0 %v4687_v58 }
 0xa7c   : > { %4532 = vmatmul.mubr.msk.f32.gmra.mxu0 %vm1146_vm2, %v4788_v45  ;;  %4544 = vmatprep.subr.bf16.mxu0 %v4688_v42 }
 0xa7f   : > { %v4792_v38 = vpop.eup %4791  ;;  %4545 = vmatpush3.bf16.msra.mxu0 %v4688_v42 }
 0xa80   : > { %v4794_v39 = vpop.eup %4793  ;;  %4536 = vmatprep.mubr.msk.f32.mxu1 %vm1146_vm2, %v4792_v38 }
 0xa81   : > { %4537 = vmatmul.mubr.msk.f32.vlgmr.msra.gmra.mxu1 %vm1146_vm2, %v4794_v39 }
 0xa86   : > { %v4796_v40 = vpop.eup %4795 }
 0xa87   : > { %v4798_v41 = vpop.eup %4797  ;;  %4539 = vmatprep.mubr.msk.f32.mxu1 %vm1146_vm2, %v4796_v40 }
 0xa88   : > { %4540 = vmatmul.mubr.msk.f32.gmra.mxu1 %vm1146_vm2, %v4798_v41 }
 0xb2c   : > { %v4506_v43 = vpop.f32.mrf.mxu1 }
 0xb2d   : > { %v4514_v44 = vpop.f32.mrf.mxu0  ;;  %v2808_v53 = vmul.f32 %v4506_v43, %v2805_v48 }
 0xb2e   : > { %v2785_v46 = vpop.f32.mrf.mxu1  ;;  %v2932_v54 = vmul.f32 %v4514_v44, %v2929_v16 }
 0xb2f   : > { %v2909_v47 = vpop.f32.mrf.mxu0  ;;  %v2807_v10 = vmul.f32 %v2805_v48, %v2785_v46  ;;  %v3311_v46 = vpop.permute.xlu0 %3310 }
 0xb30   : > { %v2931_v50 = vmul.f32 %v2929_v16, %v2909_v47  ;;  %v2936_v60 = vadd.f32 %v2932_v54, %v2808_v53 }
 0xb32   : > { %v2935_v61 = vadd.f32 %v2931_v50, %v2807_v10 }
 0xb33   : > { %v4509_v49 = vpop.f32.mrf.mxu1 }
 0xb34   : > { %v4517_v51 = vpop.f32.mrf.mxu0  ;;  %v2810_v3 = vmul.f32 %v4509_v49, %v2805_v48 }
 0xb35   : > { %v2795_v6 = vpop.f32.mrf.mxu1  ;;  %v2934_v4 = vmul.f32 %v4517_v51, %v2929_v16 }
 0xb36   : > { %v2919_v52 = vpop.f32.mrf.mxu0  ;;  %v2809_v5 = vmul.f32 %v2805_v48, %v2795_v6 }
 0xb37   : > { %v4522_v56 = vpop.f32.mrf.mxu1  ;;  %v2933_v9 = vmul.f32 %v2929_v16, %v2919_v52  ;;  %v2938_v31 = vadd.f32 %v2934_v4, %v2810_v3 }
 0xb38   : > { %v4530_v55 = vpop.f32.mrf.mxu0  ;;  %v3056_v57 = vmul.f32 %v4522_v56, %v3053_v7 }
 0xb39   : > { %v3033_v8 = vpop.f32.mrf.mxu1  ;;  %v3180_v11 = vmul.f32 %v4530_v55, %v3177_v2  ;;  %v2937_v32 = vadd.f32 %v2933_v9, %v2809_v5 }
 0xb3a   : > { %v3055_v59 = vmul.f32 %v3053_v7, %v3033_v8  ;;  %v3157_v62 = vpop.f32.mrf.mxu0  ;;  %v3060_v0 = vadd.f32 %v3056_v57, %v2936_v60 }
 0xb3b   : > { %v4525_v63 = vpop.f32.mrf.mxu1  ;;  %v3179_v17 = vmul.f32 %v3177_v2, %v3157_v62 }
 0xb3c   : > { %v3059_v1 = vadd.f32 %v3055_v59, %v2935_v61  ;;  %v4533_v19 = vpop.f32.mrf.mxu0  ;;  %v3058_v23 = vmul.f32 %v4525_v63, %v3053_v7  ;;  %v3184_v27 = vadd.f32 %v3180_v11, %v3060_v0 }
 0xb3d   : > { %v3043_v12 = vpop.f32.mrf.mxu1  ;;  %v3182_v36 = vmul.f32 %v4533_v19, %v3177_v2  ;;  %v4108_v19 = vld [vmem:[#allocation6 + $0x1] ss:$0 sm:$0xff] }
 0xb3e   : > { %v3057_v26 = vmul.f32 %v3053_v7, %v3043_v12  ;;  %v3183_v28 = vadd.f32 %v3179_v17, %v3059_v1  ;;  %v3167_v15 = vpop.f32.mrf.mxu0  ;;  %v3062_v45 = vadd.f32 %v3058_v23, %v2938_v31  ;;  %v4690_v23 = vld [vmem:[%s5739_s8] sm:$0xff]  }
 0xb3f   : > { %v3181_v37 = vmul.f32 %v3177_v2, %v3167_v15 }
 0xb40   : > { %v3061_v34 = vadd.f32 %v3057_v26, %v2937_v32  ;;  %v3186_v39 = vadd.f32 %v3182_v36, %v3062_v45  ;;  %v3448_v26 = vld [vmem:[#allocation6 + $0x1] sm:$0x3]  ;;  %v4693_v32 = vld [vmem:[%s5740_s9 + $0x28] sm:$0xff]  }
 0xb41   : > { %v4538_v22 = vpop.f32.mrf.mxu1  ;;  %v3457_v31 = vrot.slane %v3448_v26, %v1901_v21 }
 0xb42   : > { %v3289_v14 = vmul.f32 %v4538_v22, %v3184_v27  ;;  %v3185_v40 = vadd.f32 %v3181_v37, %v3061_v34  ;;  %v4689_v22 = vld [vmem:[%s5739_s8 + $0x8] sm:$0xff]   ;;  %v4691_v27 = vld [vmem:[%s5740_s9 + $0x38] sm:$0xff]  }
 0xb43   : > { %v3269_v29 = vpop.f32.mrf.mxu1  ;;  %4550 = vmatprep.subr.bf16.mxu1 %v4689_v22  ;;  %4558 = vmatprep.subr.bf16.mxu0 %v4691_v27 }
 0xb44   : > { %v3288_v33 = vmul.f32 %v3269_v29, %v3183_v28  ;;  %4551 = vmatpush3.bf16.msra.mxu1 %v4689_v22  ;;  %v4692_v28 = vld [vmem:[%s5740_s9 + $0x30] sm:$0xff]   ;;  %v3453_v29 = vrot.slane %v3448_v26, %v1897_v20  ;;  %v4694_v20 = vld [vmem:[%s5740_s9 + $0x20] sm:$0xff]  }
 0xb45   : > { %4552 = vmatprep.subr.bf16.mxu1 %v4690_v23 }
 0xb46   : > { %v3292_v35 = vpack.c.bf16 %v3289_v14, %v3288_v33 }
 0xb48   : > { %4546 = vmatprep.mubr.msk.bf16.mxu0 %vm642_vm0, %v3292_v35  ;;  %v4541_v38 = vpop.f32.mrf.mxu1  ;;  %4553 = vmatpush3.bf16.msra.mxu1 %v4690_v23 }
 0xb49   : > { %v3291_v58 = vmul.f32 %v4541_v38, %v3186_v39 }
 0xb4a   : > { %v3279_v41 = vpop.f32.mrf.mxu1 }
 0xb4b   : > { %v3290_v42 = vmul.f32 %v3279_v41, %v3185_v40 }
 0xb4d   : > { %v3293_v43 = vpack.c.bf16 %v3291_v58, %v3290_v42 }
 0xb4f   : > { %4547 = vmatmul.mubr.msk.bf16.vlgmr.msra.gmra.mxu0 %vm642_vm0, %v3293_v43 }
 0xb50   : > { %4559 = vmatpush3.bf16.msra.mxu0 %v4691_v27 }
 0xb51   : > { %4560 = vmatprep.subr.bf16.mxu0 %v4692_v28 }
 0xb54   : > { %4561 = vmatpush3.bf16.msra.mxu0 %v4692_v28 }
 0xb55   : > { %4562 = vmatprep.subr.bf16.mxu0 %v4693_v32 }
 0xb58   : > { %4563 = vmatpush3.bf16.msra.mxu0 %v4693_v32 }
 0xb59   : > { %4564 = vmatprep.subr.bf16.mxu0 %v4694_v20 }
 0xb5c   : > { %4565 = vmatpush3.bf16.msra.mxu0 %v4694_v20 }
 0xb5d   : > { %4566 = vmatprep.subr.bf16.mxu0 %v4695_v18 }
 0xb60   : > { %4567 = vmatpush3.bf16.msra.mxu0 %v4695_v18 }
 0xc0f   : > { %v4548_v44 = vpop.f32.mrf.mxu0 }
 0xc10   : > { %v3362_v52 = vadd.f32 %v4548_v44, %v3311_v46 }
 0xc11   : > { %v3353_v47 = vpop.f32.mrf.mxu0 }
 0xc12   : > { %v3354_v48 = vadd.f32 %v3353_v47, %v3311_v46  ;;  %v3370_v55 = vadd.f32 %v3362_v52, %v5468_v30 }
 0xc13   : > { %v4549_v49 = vpop.f32.mrf.mxu0 }
 0xc14   : > { %v3365_v51 = vadd.f32 %v4549_v49, %v3311_v46  ;;  %v3368_v6 = vadd.f32 %v3354_v48, %v5462_v24  ;;  %v3379_v24 = vsel %vm642_vm0, %v3370_v55, 0.0 }
 0xc15   : > { %v3356_v16 = vpop.f32.mrf.mxu0 }
 0xc16   : > { %v3357_v53 = vadd.f32 %v3356_v16, %v3311_v46  ;;  %v3373_v54 = vsel %vm642_vm0, %v3368_v6, 0.0  ;;  %v3371_v10 = vadd.f32 %v3365_v51, %v5471_v13 }
 0xc17   : > { %3374 = vadd.xlane.f32.xlu1 %v3373_v54 }
 0xc18   : > { %v3369_v50 = vadd.f32 %v3357_v53, %v5464_v25  ;;  %v3382_v7 = vsel %vm642_vm0, %v3371_v10, 0.0 }
 0xc1a   : > { %v3376_v56 = vsel %vm642_vm0, %v3369_v50, 0.0 }
 0xc1b   : > { %3377 = vadd.xlane.f32.xlu0 %v3376_v56  ;;  %3383 = vadd.xlane.f32.xlu1 %v3382_v7 }
 0xc1f   : > { %3380 = vadd.xlane.f32.xlu0 %v3379_v24  ;;  %v4697_v24 = vld [vmem:[%s5740_s9 + $0x8] sm:$0xff]  }
 0xca0   : > { %v3375_v57 = vpop.xlane.xlu1 %3374 }
 0xca1   : > { %v3385_v8 = vmul.f32 0.03125, %v3375_v57  ;;  %v4698_v57 = vld [vmem:[%s5740_s9] sm:$0xff]  }
 0xca3   : > { %v5596_v59 = vsub.f32 %v3368_v6, %v3385_v8  ;;  %v5654_v8 = vld [vmem:[#allocation6 + $0x2] ss:$0 sm:$0xff] }
 0xca4   : > { %v3378_v60 = vpop.xlane.xlu0 %3377  ;;  %v3384_v13 = vpop.xlane.xlu1 %3383 }
 0xca5   : > { %v3386_v61 = vmul.f32 0.03125, %v3378_v60  ;;  %v3388_v63 = vmul.f32 0.03125, %v3384_v13  ;;  %v3393_v25 = vmul.f32 %v5596_v59, %v5596_v59 }
 0xca7   : > { %v5600_v62 = vsub.f32 %v3369_v50, %v3386_v61  ;;  %v5602_v0 = vsub.f32 %v3371_v10, %v3388_v63  ;;  %v3397_v30 = vsel %vm642_vm0, %v3393_v25, 0.0 }
 0xca8   : > { %v3381_v1 = vpop.xlane.xlu0 %3380  ;;  %3398 = vadd.xlane.f32.xlu0 %v3397_v30 }
 0xca9   : > { %v3387_v2 = vmul.f32 0.03125, %v3381_v1  ;;  %v3394_v3 = vmul.f32 %v5600_v62, %v5600_v62  ;;  %v3396_v5 = vmul.f32 %v5602_v0, %v5602_v0 }
 0xcab   : > { %v3391_v4 = vsub.f32 %v3370_v55, %v3387_v2  ;;  %v3400_v12 = vsel %vm642_vm0, %v3394_v3, 0.0  ;;  %v3406_v17 = vsel %vm642_vm0, %v3396_v5, 0.0  ;;  %v4696_v55 = vld [vmem:[%s5740_s9 + $0x10] sm:$0xff]  }
 0xcac   : > { %3401 = vadd.xlane.f32.xlu1 %v3400_v12  ;;  %4568 = vmatprep.subr.bf16.mxu0 %v4696_v55 }
 0xcad   : > { %v3395_v9 = vmul.f32 %v3391_v4, %v3391_v4  ;;  %4569 = vmatpush3.bf16.msra.mxu0 %v4696_v55 }
 0xcae   : > { %4570 = vmatprep.subr.bf16.mxu0 %v4697_v24 }
 0xcaf   : > { %v3403_v11 = vsel %vm642_vm0, %v3395_v9, 0.0 }
 0xcb0   : > { %3404 = vadd.xlane.f32.xlu0 %v3403_v11  ;;  %3407 = vadd.xlane.f32.xlu1 %v3406_v17 }
 0xcb1   : > { %4571 = vmatpush3.bf16.msra.mxu0 %v4697_v24 }
 0xcb2   : > { %4572 = vmatprep.subr.bf16.mxu0 %v4698_v57 }
 0xcb5   : > { %4573 = vmatpush3.bf16.msra.mxu0 %v4698_v57 }
 0xcc1   : > { %3470 = vrot.lane.b32.xlu1 %v3453_v29, %s4974_s17 }
 0xcc5   : > { %3472 = vrot.lane.b32.xlu1 %v3457_v31, %s4974_s17 }
 0xcc6   : > { %3435 = vrot.lane.b32.xlu0 %v4108_v19, %s4973_s10 }
 0xcca   : > { %3607 = vrot.lane.b32.xlu0 %v5654_v8, %s4974_s17  ;;  %s5782_s17 = sld [smem:[#allocation21_spill]] }
 0xd31   : > { %v3399_v21 = vpop.xlane.xlu0 %3398 }
 0xd32   : > { %v3409_v14 = vmul.f32 0.03125, %v3399_v21 }
 0xd34   : > { %v3413_v33 = vadd.f32 1e-05, %v3409_v14 }
 0xd35   : > { %v3402_v15 = vpop.xlane.xlu1 %3401 }
 0xd36   : > { %4799 = vrsqrt.f32 %v3413_v33  ;;  %v3410_v45 = vmul.f32 0.03125, %v3402_v15 }
 0xd38   : > { %v3414_v34 = vadd.f32 1e-05, %v3410_v45 }
 0xd39   : > { %v3405_v35 = vpop.xlane.xlu0 %3404  ;;  %v3408_v36 = vpop.xlane.xlu1 %3407 }
 0xd3a   : > { %4801 = vrsqrt.f32 %v3414_v34  ;;  %v3411_v37 = vmul.f32 0.03125, %v3405_v35  ;;  %v3412_v38 = vmul.f32 0.03125, %v3408_v36 }
 0xd3c   : > { %v3415_v39 = vadd.f32 1e-05, %v3411_v37  ;;  %v3416_v40 = vadd.f32 1e-05, %v3412_v38 }
 0xd3d   : > { %v3436_v46 = vpop.permute.xlu0 %3435 }
 0xd3e   : > { %4803 = vrsqrt.f32 %v3415_v39 }
 0xd3f   : > { %4805 = vrsqrt.f32 %v3416_v40 }
 0xd43   : > { %v4800_v41 = vpop.eup %4799 }
 0xd44   : > { %v3421_v58 = vmul.f32 %v4800_v41, %v5596_v59  ;;  %v3471_v59 = vpop.permute.xlu1 %3470 }
 0xd46   : > { %v3431_v43 = vmul.f32 %v4108_v19, %v3421_v58 }
 0xd47   : > { %v4802_v42 = vpop.eup %4801 }
 0xd48   : > { %v3422_v44 = vmul.f32 %v4802_v42, %v5600_v62  ;;  %v3438_v6 = vadd.f32 %v3436_v46, %v3431_v43  ;;  %v3473_v60 = vpop.permute.xlu1 %3472 }
 0xd49   : > { %v3474_v63 = vsel %vm1919_vm3, %v3471_v59, %v3473_v60 }
 0xd4a   : > { %v3432_v47 = vmul.f32 %v4108_v19, %v3422_v44 }
 0xd4b   : > { %v4804_v48 = vpop.eup %4803 }
 0xd4c   : > { %v4806_v49 = vpop.eup %4805  ;;  %v3423_v51 = vmul.f32 %v4804_v48, %v3391_v4  ;;  %v3439_v16 = vadd.f32 %v3436_v46, %v3432_v47 }
 0xd4d   : > { %v3424_v52 = vmul.f32 %v4806_v49, %v5602_v0 }
 0xd4e   : > { %v3433_v53 = vmul.f32 %v4108_v19, %v3423_v51  ;;  %v3442_v54 = vpack.c.bf16 %v3439_v16, %v3438_v6 }
 0xd4f   : > { %v3434_v10 = vmul.f32 %v4108_v19, %v3424_v52  ;;  %v3608_v19 = vpop.permute.xlu0 %3607 }
 0xd50   : > { %v3440_v50 = vadd.f32 %v3436_v46, %v3433_v53  ;;  %4554 = vmatprep.mubr.msk.bf16.mxu1 %vm642_vm0, %v3442_v54  ;;  %v4699_v53 = vld [vmem:[#allocation8 + $0x8] sm:$0xff]   ;;  %v4976_v54 = vmov 0.0  }
 0xd51   : > { %v3441_v56 = vadd.f32 %v3436_v46, %v3434_v10  ;;  %4578 = vmatprep.subr.bf16.mxu1 %v4976_v54  ;;  %v4700_v10 = vld [vmem:[#allocation8] sm:$0xff]  }
 0xd53   : > { %v3443_v7 = vpack.c.bf16 %v3441_v56, %v3440_v50 }
 0xd55   : > { %4555 = vmatmul.mubr.msk.bf16.vlgmr.msra.gmra.mxu1 %vm642_vm0, %v3443_v7 }
 0xd56   : > { %4579 = vmatpush3.bf16.msra.mxu1 %v4699_v53  ;;  %4582 = vmatprep.mubr.msk.bf16.mxu1 %vm4977_vm4, %v4976_v54 }
 0xd57   : > { %4580 = vmatprep.subr.bf16.mxu1 %v4976_v54 }
 0xd5a   : > { %4581 = vmatpush3.bf16.msra.mxu1 %v4700_v10 }
 0xd5b   : > { %4586 = vmatprep.subr.bf16.mxu1 %v4976_v54 }
 0xe15   : > { %v4556_v13 = vpop.f32.mrf.mxu1 }
 0xe16   : > { %v3525_v30 = vadd.f32 %v4556_v13, %v3474_v63 }
 0xe17   : > { %v3516_v61 = vpop.f32.mrf.mxu1 }
 0xe18   : > { %v3517_v62 = vadd.f32 %v3516_v61, %v3474_v63  ;;  %v3533_v5 = vmax.f32 %v3525_v30, 0.0 }
 0xe19   : > { %v4557_v25 = vpop.f32.mrf.mxu1 }
 0xe1a   : > { %v3528_v0 = vadd.f32 %v4557_v25, %v3474_v63  ;;  %v3531_v4 = vmax.f32 %v3517_v62, 0.0 }
 0xe1b   : > { %v3519_v1 = vpop.f32.mrf.mxu1 }
 0xe1c   : > { %v3520_v2 = vadd.f32 %v3519_v1, %v3474_v63  ;;  %v3534_v3 = vmax.f32 %v3528_v0, 0.0 }
 0xe1e   : > { %v3532_v12 = vmax.f32 %v3520_v2, 0.0  ;;  %v3536_v11 = vpack.c.bf16 %v3534_v3, %v3533_v5 }
 0xe20   : > { %v3535_v9 = vpack.c.bf16 %v3532_v12, %v3531_v4  ;;  %v4122_v12 = vld [vmem:[#allocation6 + $0x3] ss:$0 sm:$0xff] }
 0xe22   : > { %4574 = vmatprep.mubr.bf16.mxu0 %v3535_v9 }
 0xe23   : > { %4575 = vmatmul.mubr.bf16.vlgmr.msra.gmra.mxu0 %v3536_v11 }
 0xee3   : > { %v4576_v17 = vpop.f32.mrf.mxu0 }
 0xee4   : > { %v3653_v31 = vadd.f32 %v4576_v17, %v3608_v19 }
 0xee5   : > { %v3644_v22 = vpop.f32.mrf.mxu0 }
 0xee6   : > { %v3645_v23 = vadd.f32 %v3644_v22, %v3608_v19  ;;  %v3661_v15 = vadd.f32 %v3653_v31, %v3440_v50 }
 0xee7   : > { %v4577_v26 = vpop.f32.mrf.mxu0 }
 0xee8   : > { %v3656_v27 = vadd.f32 %v4577_v26, %v3608_v19  ;;  %v3659_v28 = vadd.f32 %v3645_v23, %v3438_v6  ;;  %v3670_v45 = vsel %vm642_vm0, %v3661_v15, 0.0 }
 0xee9   : > { %v3647_v29 = vpop.f32.mrf.mxu0 }
 0xeea   : > { %v3648_v32 = vadd.f32 %v3647_v29, %v3608_v19  ;;  %v3664_v20 = vsel %vm642_vm0, %v3659_v28, 0.0  ;;  %v3662_v18 = vadd.f32 %v3656_v27, %v3441_v56 }
 0xeeb   : > { %3665 = vadd.xlane.f32.xlu1 %v3664_v20 }
 0xeec   : > { %v3660_v21 = vadd.f32 %v3648_v32, %v3439_v16  ;;  %v3673_v33 = vsel %vm642_vm0, %v3662_v18, 0.0 }
 0xeee   : > { %v3667_v14 = vsel %vm642_vm0, %v3660_v21, 0.0 }
 0xeef   : > { %3668 = vadd.xlane.f32.xlu0 %v3667_v14  ;;  %3674 = vadd.xlane.f32.xlu1 %v3673_v33  ;;  %v4702_v33 = vld [vmem:[%s5742_s11] sm:$0xff]  }
 0xef3   : > { %3671 = vadd.xlane.f32.xlu0 %v3670_v45 }
 0xf74   : > { %v3666_v34 = vpop.xlane.xlu1 %3665 }
 0xf75   : > { %v3676_v35 = vmul.f32 0.03125, %v3666_v34 }
 0xf77   : > { %v3680_v36 = vsub.f32 %v3659_v28, %v3676_v35 }
 0xf78   : > { %v3669_v37 = vpop.xlane.xlu0 %3668  ;;  %v3675_v38 = vpop.xlane.xlu1 %3674 }
 0xf79   : > { %v3677_v39 = vmul.f32 0.03125, %v3669_v37  ;;  %v3679_v40 = vmul.f32 0.03125, %v3675_v38  ;;  %v3684_v41 = vmul.f32 %v3680_v36, %v3680_v36 }
 0xf7b   : > { %v3681_v58 = vsub.f32 %v3660_v21, %v3677_v39  ;;  %v3683_v42 = vsub.f32 %v3662_v18, %v3679_v40  ;;  %v3688_v43 = vsel %vm642_vm0, %v3684_v41, 0.0  ;;  %v4701_v18 = vld [vmem:[%s5742_s11 + $0x8] sm:$0xff]   ;;  %v4129_v39 = vld [vmem:[%s5744_s13] ss:$0 sm:$0xff] }
 0xf7c   : > { %v3672_v44 = vpop.xlane.xlu0 %3671  ;;  %3689 = vadd.xlane.f32.xlu0 %v3688_v43 }
 0xf7d   : > { %v3678_v46 = vmul.f32 0.03125, %v3672_v44  ;;  %v3685_v47 = vmul.f32 %v3681_v58, %v3681_v58  ;;  %v3687_v51 = vmul.f32 %v3683_v42, %v3683_v42 }
 0xf7f   : > { %v3682_v48 = vsub.f32 %v3661_v15, %v3678_v46  ;;  %v3691_v49 = vsel %vm642_vm0, %v3685_v47, 0.0  ;;  %v3697_v52 = vsel %vm642_vm0, %v3687_v51, 0.0 }
 0xf80   : > { %3692 = vadd.xlane.f32.xlu1 %v3691_v49 }
 0xf81   : > { %v3686_v6 = vmul.f32 %v3682_v48, %v3682_v48 }
 0xf83   : > { %v3694_v16 = vsel %vm642_vm0, %v3686_v6, 0.0 }
 0xf84   : > { %3695 = vadd.xlane.f32.xlu0 %v3694_v16  ;;  %3698 = vadd.xlane.f32.xlu1 %v3697_v52 }
 0xf9a   : > { %3716 = vrot.lane.b32.xlu0 %v5654_v8, %s4975_s20  ;;  %s5687_s20 = scalar_lea.hbm %s5782_s17, %s4131_s18 }
0x1005   : > { %v3690_v50 = vpop.xlane.xlu0 %3689 }
0x1006   : > { %v3700_v56 = vmul.f32 0.03125, %v3690_v50 }
0x1008   : > { %v3704_v7 = vadd.f32 1e-05, %v3700_v56 }
0x1009   : > { %v3693_v55 = vpop.xlane.xlu1 %3692 }
0x100a   : > { %4807 = vrsqrt.f32 %v3704_v7  ;;  %v3701_v24 = vmul.f32 0.03125, %v3693_v55 }
0x100c   : > { %v3705_v57 = vadd.f32 1e-05, %v3701_v24 }
0x100d   : > { %v3696_v59 = vpop.xlane.xlu0 %3695  ;;  %v3699_v8 = vpop.xlane.xlu1 %3698 }
0x100e   : > { %4809 = vrsqrt.f32 %v3705_v57  ;;  %v3702_v60 = vmul.f32 0.03125, %v3696_v59  ;;  %v3703_v13 = vmul.f32 0.03125, %v3699_v8 }
0x1010   : > { %v3706_v61 = vadd.f32 1e-05, %v3702_v60  ;;  %v3707_v63 = vadd.f32 1e-05, %v3703_v13 }
0x1011   : > { %v3717_v30 = vpop.permute.xlu0 %3716 }
0x1012   : > { %4811 = vrsqrt.f32 %v3706_v61 }
0x1013   : > { %4813 = vrsqrt.f32 %v3707_v63 }
0x1017   : > { %v4808_v25 = vpop.eup %4807 }
0x1018   : > { %v3712_v62 = vmul.f32 %v4808_v25, %v3680_v36 }
0x101a   : > { %v3719_v2 = vmul.f32 %v3717_v30, %v3712_v62 }
0x101b   : > { %v4810_v0 = vpop.eup %4809 }
0x101c   : > { %v3713_v1 = vmul.f32 %v4810_v0, %v3681_v58  ;;  %v3729_v22 = vadd.f32 %v4122_v12, %v3719_v2 }
0x101e   : > { %v3720_v3 = vmul.f32 %v3717_v30, %v3713_v1 }
0x101f   : > { %v4812_v4 = vpop.eup %4811 }
0x1020   : > { %v4814_v5 = vpop.eup %4813  ;;  %v3714_v9 = vmul.f32 %v4812_v4, %v3682_v48  ;;  %v3730_v11 = vadd.f32 %v4122_v12, %v3720_v3 }
0x1021   : > { %v3715_v17 = vmul.f32 %v4814_v5, %v3683_v42 }
0x1022   : > { %v3721_v19 = vmul.f32 %v3717_v30, %v3714_v9  ;;  %v3733_v27 = vadd.f32 %v3730_v11, %v3729_v22  ;;  %v3734_v28 = vmax.f32 %v3729_v22, %v3730_v11 }
0x1023   : > { %v3722_v23 = vmul.f32 %v3717_v30, %v3715_v17 }
0x1024   : > { %v3731_v26 = vadd.f32 %v4122_v12, %v3721_v19 }
0x1025   : > { %v3732_v29 = vadd.f32 %v4122_v12, %v3722_v23 }
0x1026   : > { %v3735_v31 = vadd.f32 %v3733_v27, %v3731_v26  ;;  %v3736_v32 = vmax.f32 %v3734_v28, %v3731_v26 }
0x1028   : > { %v3738_v20 = vmax.f32 %v3736_v32, %v3732_v29  ;;  %v3737_v21 = vadd.f32 %v3735_v31, %v3732_v29 }
0x102a   : > { %v3745_v14 = vpack.c.bf16 %v3738_v20, %v3738_v20  ;;  %v3739_v15 = vmul.f32 0.25, %v3737_v21 }
0x102c   : > { %4583 = vmatmul.mubr.msk.bf16.vlgmr.msra.gmra.mxu1 %vm642_vm0, %v3745_v14  ;;  %v3740_v45 = vpack.c.bf16 %v3739_v15, %v3739_v15 }
0x102d   : > { %4587 = vmatpush3.bf16.msra.mxu1 %v4701_v18  ;;  %4590 = vmatprep.mubr.msk.bf16.mxu1 %vm4977_vm4, %v4976_v54 }
0x102e   : > { %4588 = vmatprep.subr.bf16.mxu1 %v4976_v54 }
0x1031   : > { %4589 = vmatpush3.bf16.msra.mxu1 %v4702_v33 }
0x1034   : > { %4591 = vmatmul.mubr.msk.bf16.vlgmr.msra.gmra.mxu1 %vm642_vm0, %v3740_v45 }
0x10ec   : > { %v3799_v34 = vpop.f32.mrf.mxu1 }
0x10ee   : > { %v4584_v35 = vpop.f32.mrf.mxu1 }
0x10f0   : > { %v3802_v36 = vpop.f32.mrf.mxu1 }
0x10f2   : > { %v4585_v37 = vpop.f32.mrf.mxu1 }
0x10f4   : > { %v3854_v38 = vpop.f32.mrf.mxu1 }
0x10f5   : > { %v3855_v40 = vadd.f32 %v3854_v38, %v3799_v34 }
0x10f6   : > { %v4592_v41 = vpop.f32.mrf.mxu1 }
0x10f7   : > { %v3867_v58 = vadd.f32 %v4129_v39, %v3855_v40 }
0x10f8   : > { %v3857_v42 = vpop.f32.mrf.mxu1 }
0x10f9   : > { %3868 = vst.msk [vmem:[%s606_s5] sm:$0xff] %vm642_vm0, %v3867_v58 }
0x10fa   : > { %v4593_v43 = vpop.f32.mrf.mxu1 }
0x10fb   : > { %4911 = shalt.err (!%p4908_p1)
}
0x10fc   : > { %s4912_s21 = scalar_lea.hbm %s5687_s20, 128  ;;  %s4916_s5 = scalar_lea.hbm %s5782_s17, 256 }
0x10fd   : > { %p4913_p0 = scmp.ne.s32.totalorder %s5687_s20, %s4912_s21  ;;  %p4917_p2 = scmp.lt.s32.totalorder %s5687_s20, %s5782_s17 }
0x10fe   : > { %p4918_p3 = scmp.lt.s32.totalorder %s4916_s5, %s4912_s21 }
0x10ff   : > { %p4914_p9 = pnand %p4913_p0, %p5783_p10 }
0x1100   : > { %p4919_p4 = por %p4918_p3, %p4917_p2 }
0x1101   : > { %p4915_p13 = pneg %p4914_p9 }
0x1103   : > { %p4920_p11 = pnand %p4919_p4, %p4915_p13 }
0x1105   : > { %4923 = shalt.err (!%p4920_p11)
}
0x1106   : > { %4606 = dma.vmem_to_hbm [thread:$0]  (%p5783_p10), %s5689_s19, 128, %s5687_s20, %s3870_s25  }
0x1107 PF: > { %s5784_s16 = sld [smem:[#allocation13_spill]] }
0x1108   : > { %s5785_s29 = sld [smem:[#allocation17_spill]] }
0x110d   : > { %s3895_s27 = sand.u32 1, %s5784_s16  }
0x110e   : > { %p5786_p7 = scmp.ne.s32.totalorder %s5785_s29, 0  ;;  %s3896_s30 = scalar_lea.sflag [#allocation5], %s3895_s27 }
0x1110   : > { %p4619_p6 = pnand %p3984_p8, %p5786_p7 }
0x1112   : > { %p4620_p5 = pneg %p4619_p6 }
0x1114   : > { %4949 = dma.done.wait (%p4620_p5), %s3896_s30, 128  }
0x1115   : > { %4951 = vsyncadd (%p4620_p5), %s3896_s30, 4294967168  ;;  %s5787_s24 = sld [smem:[#allocation14_spill]]  ;;  %s5789_s21 = smov %s4958_s22 }
0x1116   : > { %s5788_s0 = sld [smem:[#allocation15_spill]]  ;;  %s5790_s22 = smov %s4962_s23 }
0x111b   : > { %p28_p12 = scmp.ge.s32.totalorder %s5787_s24, 4  }
0x111c   : > { %s5791_s23 = smov %s5788_s0 }
0x111d   :  { %30 = sbr.rel (!%p28_p12) target bundleno = 10 (0xa), region = 175 }
0x1122   :  { %3901 = vsyncpa [#allocation4], 1 }
0x1123   :  { %3903 = vsyncpa [#allocation4 + $0x1], 1 }
0x1124   :  { %3904 = vsyncpa [#allocation7], 1 }
0x1125   :  { %3905 = vsyncpa [#allocation5], 1 }
0x1126   :  { %3907 = vsyncpa [#allocation5 + $0x1], 1 }

</bundles_post_ra>
